<compile_context>
chip_gen: v6e
topology: v6e:2x2x1
jax: 0.10.0
libtpu: 0.0.40
codegen_flags: <defaults>
</compile_context>

<pallas_src>
import functools
import math

import jax
import jax.numpy as jnp
from jax.experimental import pallas as pl
from jax.experimental.pallas import tpu as pltpu


# ----------------------------- config ---------------------------------------

class Cfg:
    vocab = 64
    hidden = 32
    heads = 4
    head_dim = 8            # hidden // heads
    intermediate = 64
    layers = 2
    max_pos = 32
    type_vocab = 2
    num_labels = 2
    eps = 1e-5


# ------------------------- in-kernel helpers ---------------------------------

def _gelu(x):
    # TODO(synk): RoBERTa uses exact erf-GELU; tanh approximation used here for
    # portable Mosaic lowering (numerically ~1e-3 close).
    return 0.5 * x * (1.0 + jnp.tanh(0.7978845608028654 * (x + 0.044715 * x * x * x)))


def _layernorm(h, g, b, eps):
    mu = jnp.mean(h, axis=-1, keepdims=True)
    var = jnp.mean((h - mu) * (h - mu), axis=-1, keepdims=True)
    return (h - mu) * jax.lax.rsqrt(var + eps) * g + b


def _ce_mean(logits, labels, ignore_index):
    """torch.nn.CrossEntropyLoss(reduction='mean', ignore_index=...) on in-VMEM logits."""
    n, c = logits.shape
    m = jnp.max(logits, axis=-1, keepdims=True)
    lse = jnp.log(jnp.sum(jnp.exp(logits - m), axis=-1, keepdims=True)) + m
    col = jax.lax.broadcasted_iota(jnp.int32, (n, c), 1)
    picked = jnp.sum(jnp.where(col == labels, logits, 0.0), axis=-1, keepdims=True)
    valid = (labels != ignore_index).astype(jnp.float32)
    # No max(cnt, 1) guard: all-ignored labels give NaN, matching torch.
    loss_sum = jnp.sum((lse - picked) * valid, axis=0, keepdims=True)   # (1,1)
    cnt = jnp.sum(valid, axis=0, keepdims=True)                         # (1,1)
    return loss_sum / cnt


# ----------------------- fused encoder kernel --------------------------------

def _encoder_kernel(x_ref, bias_ref, eg_ref, eb_ref,
                    qkvw_ref, qkvb_ref, aow_ref, aob_ref, ao_lng_ref, ao_lnb_ref,
                    f1w_ref, f1b_ref, f2w_ref, f2b_ref, ff_lng_ref, ff_lnb_ref,
                    o_ref, *, layers, heads, head_dim, eps):
    hid = heads * head_dim
    scale = 1.0 / math.sqrt(head_dim)

    bias = bias_ref[0]                                    # (M, M) additive mask
    x = _layernorm(x_ref[0], eg_ref[...], eb_ref[...], eps)

    for l in range(layers):                               # unrolled (layers=2)
        # Fused Q/K/V projection: one MXU pass with N = 3H.
        qkv = (jnp.dot(x, qkvw_ref[l], preferred_element_type=jnp.float32)
               + qkvb_ref[l])                             # (M, 3H)
        ao_w = aow_ref[l]                                 # (H, H)
        attn = aob_ref[l]                                 # (1, H) bias, broadcasts
        for h in range(heads):                            # unrolled (heads=4)
            lo = h * head_dim
            q = qkv[:, lo:lo + head_dim]                  # (M, dh)
            k = qkv[:, hid + lo:hid + lo + head_dim]
            v = qkv[:, 2 * hid + lo:2 * hid + lo + head_dim]
            # Attention over ALL batches at once; the block-diagonal bias
            # zeroes cross-batch attention, so no per-(batch, head) grid.
            s = jax.lax.dot_general(q, k, (((1,), (1,)), ((), ())),
                                    preferred_element_type=jnp.float32)
            s = s * scale + bias
            m = jnp.max(s, axis=-1, keepdims=True)
            p = jnp.exp(s - m)
            p = p / jnp.sum(p, axis=-1, keepdims=True)
            ctx = jnp.dot(p, v, preferred_element_type=jnp.float32)      # (M, dh)
            # Per-head output projection accumulated directly -> no concat /
            # head transpose; activations stay (M, H) lane-dense.
            attn = attn + jnp.dot(ctx, ao_w[lo:lo + head_dim, :],
                                  preferred_element_type=jnp.float32)
        x = _layernorm(attn + x, ao_lng_ref[l], ao_lnb_ref[l], eps)
        hmid = _gelu(jnp.dot(x, f1w_ref[l], preferred_element_type=jnp.float32)
                     + f1b_ref[l])
        ff = jnp.dot(hmid, f2w_ref[l], preferred_element_type=jnp.float32) + f2b_ref[l]
        x = _layernorm(ff + x, ff_lng_ref[l], ff_lnb_ref[l], eps)

    o_ref[0] = x


def encoder(params, ids, token_type_ids, attention_mask, cfg=Cfg):
    """Fused (Ro)BERTa encoder. ids/token_type_ids/attention_mask: (P, B, S)."""
    P, B, S = ids.shape
    H, L, I = cfg.hidden, cfg.layers, cfg.intermediate
    M = B * S

    # Embedding gathers are plain-JAX glue (eval mode => no dropout).
    pos_ids = jnp.arange(S, dtype=jnp.int32)
    emb = (jnp.take(params["word_emb"], ids, axis=0)
           + jnp.take(params["pos_emb"], pos_ids, axis=0)[None, None]
           + jnp.take(params["type_emb"], token_type_ids, axis=0))       # (P,B,S,H)
    x = emb.reshape(P, M, H).astype(jnp.float32)

    # Additive attention bias: block-diagonal over batches (cross-batch = -1e9)
    # + HF-style padding mask ((1 - mask) * -10000) on the key columns.
    batch_id = jnp.repeat(jnp.arange(B, dtype=jnp.int32), S)             # (M,)
    same_batch = batch_id[:, None] == batch_id[None, :]                  # (M, M)
    key_keep = attention_mask.reshape(P, M).astype(jnp.float32)          # (P, M)
    bias = jnp.where(same_batch[None, :, :],
                     (1.0 - key_keep)[:, None, :] * -10000.0,
                     -1e9).astype(jnp.float32)                           # (P, M, M)

    def fullspec(shape):
        return pl.BlockSpec(shape, lambda p: (0,) * len(shape))

    kernel = functools.partial(_encoder_kernel, layers=L, heads=cfg.heads,
                               head_dim=cfg.head_dim, eps=cfg.eps)
    return pl.pallas_call(
        kernel,
        out_shape=jax.ShapeDtypeStruct((P, M, H), jnp.float32),
        grid=(P,),
        in_specs=[
            pl.BlockSpec((1, M, H), lambda p: (p, 0, 0)),       # embeddings
            pl.BlockSpec((1, M, M), lambda p: (p, 0, 0)),       # attention bias
            fullspec((1, H)), fullspec((1, H)),                 # emb LN
            fullspec((L, H, 3 * H)), fullspec((L, 1, 3 * H)),   # fused QKV
            fullspec((L, H, H)), fullspec((L, 1, H)),           # attn out proj
            fullspec((L, 1, H)), fullspec((L, 1, H)),           # attn out LN
            fullspec((L, H, I)), fullspec((L, 1, I)),           # ffn 1
            fullspec((L, I, H)), fullspec((L, 1, H)),           # ffn 2
            fullspec((L, 1, H)), fullspec((L, 1, H)),           # ffn LN
        ],
        out_specs=pl.BlockSpec((1, M, H), lambda p: (p, 0, 0)),
        compiler_params=pltpu.CompilerParams(
            # one grid step per encoder pass (cls / lm) -> v7x megacore sharding;
            # weights use constant block indices so they are not re-DMA'd.
            dimension_semantics=("parallel",)),
    )(x, bias, params["emb_ln_g"], params["emb_ln_b"],
      params["qkv_w"], params["qkv_b"],
      params["ao_w"], params["ao_b"], params["ao_ln_g"], params["ao_ln_b"],
      params["ff1_w"], params["ff1_b"],
      params["ff2_w"], params["ff2_b"], params["ff_ln_g"], params["ff_ln_b"])


# ----------------------- fused head (+ loss) kernels --------------------------

def _cls_loss_kernel(x_ref, wd_ref, bd_ref, wo_ref, bo_ref, lab_ref, o_ref):
    y = jnp.tanh(jnp.dot(x_ref[...], wd_ref[...], preferred_element_type=jnp.float32)
                 + bd_ref[...])
    logits = jnp.dot(y, wo_ref[...], preferred_element_type=jnp.float32) + bo_ref[...]
    o_ref[...] = _ce_mean(logits, lab_ref[...], ignore_index=-100)


def _cls_logits_kernel(x_ref, wd_ref, bd_ref, wo_ref, bo_ref, o_ref):
    y = jnp.tanh(jnp.dot(x_ref[...], wd_ref[...], preferred_element_type=jnp.float32)
                 + bd_ref[...])
    o_ref[...] = jnp.dot(y, wo_ref[...], preferred_element_type=jnp.float32) + bo_ref[...]


def _lm_loss_kernel(x_ref, wd_ref, bd_ref, g_ref, b_ref, emb_ref, lmb_ref, lab_ref,
                    o_ref, *, eps):
    h = _gelu(jnp.dot(x_ref[...], wd_ref[...], preferred_element_type=jnp.float32)
              + bd_ref[...])
    h = _layernorm(h, g_ref[...], b_ref[...], eps)
    # Tied decoder: contract against word_emb's hidden axis directly
    # (no materialized transpose of the embedding table), vocab logits stay in VMEM.
    logits = jax.lax.dot_general(h, emb_ref[...], (((1,), (1,)), ((), ())),
                                 preferred_element_type=jnp.float32) + lmb_ref[...]
    o_ref[...] = _ce_mean(logits, lab_ref[...], ignore_index=-100)


def _zero_map(ndim):
    return lambda i: (0,) * ndim


def _single_call(kernel, out_shape, args):
    return pl.pallas_call(
        kernel,
        out_shape=out_shape,
        grid=(1,),
        in_specs=[pl.BlockSpec(a.shape, _zero_map(a.ndim)) for a in args],
        out_specs=pl.BlockSpec(out_shape.shape, _zero_map(len(out_shape.shape))),
    )(*args)


def classification_loss(params, cls_hidden, labels):
    labels2 = labels.reshape(-1, 1).astype(jnp.int32)
    out = _single_call(
        _cls_loss_kernel, jax.ShapeDtypeStruct((1, 1), jnp.float32),
        (cls_hidden, params["cls_dense_w"], params["cls_dense_b"],
         params["cls_out_w"], params["cls_out_b"], labels2))
    return out[0, 0]


def classification_logits(params, cls_hidden):
    B = cls_hidden.shape[0]
    C = params["cls_out_w"].shape[1]
    return _single_call(
        _cls_logits_kernel, jax.ShapeDtypeStruct((B, C), jnp.float32),
        (cls_hidden, params["cls_dense_w"], params["cls_dense_b"],
         params["cls_out_w"], params["cls_out_b"]))


def lm_loss(params, lm_hidden, masked_lm_labels, cfg=Cfg):
    N = lm_hidden.shape[0]
    labels = masked_lm_labels.reshape(N, 1).astype(jnp.int32)
    out = _single_call(
        functools.partial(_lm_loss_kernel, eps=cfg.eps),
        jax.ShapeDtypeStruct((1, 1), jnp.float32),
        (lm_hidden, params["lm_dense_w"], params["lm_dense_b"],
         params["lm_ln_g"], params["lm_ln_b"],
         params["word_emb"], params["lm_bias"], labels))
    return out[0, 0]


# --------------------------- parameters --------------------------------------

def init_params(key, cfg=Cfg):
    keys = iter(jax.random.split(key, 64))

    def nrm(shape):
        return jax.random.normal(next(keys), shape, jnp.float32) * 0.02

    H, I, V, L = cfg.hidden, cfg.intermediate, cfg.vocab, cfg.layers
    params = {
        "word_emb": nrm((V, H)),
        "pos_emb": nrm((cfg.max_pos, H)),
        "type_emb": nrm((cfg.type_vocab, H)),
        "emb_ln_g": jnp.ones((1, H), jnp.float32),
        "emb_ln_b": jnp.zeros((1, H), jnp.float32),
        # Per-layer weights stacked over a leading layer axis; Q/K/V fused into (H, 3H).
        "qkv_w": nrm((L, H, 3 * H)), "qkv_b": jnp.zeros((L, 1, 3 * H), jnp.float32),
        "ao_w": nrm((L, H, H)), "ao_b": jnp.zeros((L, 1, H), jnp.float32),
        "ao_ln_g": jnp.ones((L, 1, H), jnp.float32),
        "ao_ln_b": jnp.zeros((L, 1, H), jnp.float32),
        "ff1_w": nrm((L, H, I)), "ff1_b": jnp.zeros((L, 1, I), jnp.float32),
        "ff2_w": nrm((L, I, H)), "ff2_b": jnp.zeros((L, 1, H), jnp.float32),
        "ff_ln_g": jnp.ones((L, 1, H), jnp.float32),
        "ff_ln_b": jnp.zeros((L, 1, H), jnp.float32),
        # RobertaClassificationHead: dense(H,H)+tanh then out_proj(H,num_labels)
        "cls_dense_w": nrm((H, H)), "cls_dense_b": jnp.zeros((1, H), jnp.float32),
        "cls_out_w": nrm((H, cfg.num_labels)),
        "cls_out_b": jnp.zeros((1, cfg.num_labels), jnp.float32),
        # RobertaLMHead: dense(H,H)+gelu, LayerNorm, decoder tied to word_emb
        "lm_dense_w": nrm((H, H)), "lm_dense_b": jnp.zeros((1, H), jnp.float32),
        "lm_ln_g": jnp.ones((1, H), jnp.float32),
        "lm_ln_b": jnp.zeros((1, H), jnp.float32),
        "lm_bias": jnp.zeros((1, V), jnp.float32),
    }
    return params


# --------------------------- model forward -----------------------------------

def my_bert_classification_lm_forward(
        params, input_ids_classification, input_ids_lm,
        token_type_ids=None, attention_mask=None,
        classification_labels=None, masked_lm_labels=None, use_lm=False, cfg=Cfg):
    """Mirrors MyBertClassificationLM.forward."""
    B, S = input_ids_classification.shape
    if token_type_ids is None:
        token_type_ids = jnp.zeros_like(input_ids_classification)
    if attention_mask is None:
        attention_mask = jnp.ones_like(input_ids_classification)

    if use_lm:
        # The encoder is shared (lm_model.roberta = classification_model.roberta):
        # batch both passes through one fused-encoder call.  The LM pass uses the
        # HF defaults (attention_mask=1, token_type_ids=0), as in the original.
        ids = jnp.stack([input_ids_classification, input_ids_lm])
        tt = jnp.stack([token_type_ids, jnp.zeros_like(input_ids_lm)])
        am = jnp.stack([attention_mask, jnp.ones_like(input_ids_lm)])
    else:
        ids = input_ids_classification[None]
        tt = token_type_ids[None]
        am = attention_mask[None]

    enc = encoder(params, ids, tt, am, cfg)                    # (P, B*S, H)
    cls_hidden = enc[0].reshape(B, S, cfg.hidden)[:, 0, :]     # <s>-token rows

    if not use_lm:
        if classification_labels is not None:
            return classification_loss(params, cls_hidden, classification_labels)
        return classification_logits(params, cls_hidden)

    assert classification_labels is not None
    cls_loss = classification_loss(params, cls_hidden, classification_labels)
    if masked_lm_labels is None:
        raise RuntimeError
    mlm_loss = lm_loss(params, enc[1], masked_lm_labels, cfg)
    return cls_loss, mlm_loss


# ------------------------------- main ----------------------------------------

if __name__ == "__main__":
    cfg = Cfg
    B, S = 2, 8

    key = jax.random.PRNGKey(0)
    kp, k1, k2, k3, k4 = jax.random.split(key, 5)
    params = init_params(kp, cfg)

    input_ids_cls = jax.random.randint(k1, (B, S), 0, cfg.vocab, dtype=jnp.int32)
    input_ids_lm = jax.random.randint(k2, (B, S), 0, cfg.vocab, dtype=jnp.int32)
    attention_mask = jnp.ones((B, S), jnp.int32)
    token_type_ids = jnp.zeros((B, S), jnp.int32)
    classification_labels = jax.random.randint(k3, (B,), 0, cfg.num_labels, dtype=jnp.int32)

    # masked-lm labels: -100 everywhere except a few masked positions
    rand_tok = jax.random.randint(k4, (B, S), 0, cfg.vocab, dtype=jnp.int32)
    mask_pos = (jnp.arange(S)[None, :] % 4 == 1)
    masked_lm_labels = jnp.where(mask_pos, rand_tok, jnp.full((B, S), -100, jnp.int32))

    cls_loss, mlm_loss = my_bert_classification_lm_forward(
        params, input_ids_cls, input_ids_lm,
        token_type_ids=token_type_ids, attention_mask=attention_mask,
        classification_labels=classification_labels,
        masked_lm_labels=masked_lm_labels, use_lm=True)

    jax.block_until_ready((cls_loss, mlm_loss))
    assert jnp.isfinite(cls_loss) and jnp.isfinite(mlm_loss)
    print("KERNEL_OK")
</pallas_src>

<mosaic_0001>
module attributes {stable_mosaic.version = 11 : i64} {
  func.func @_encoder_kernel(%arg0: i32, %arg1: memref<1x16x32xf32, #tpu.memory_space<vmem>>, %arg2: memref<1x16x16xf32, #tpu.memory_space<vmem>>, %arg3: memref<1x32xf32, #tpu.memory_space<vmem>>, %arg4: memref<1x32xf32, #tpu.memory_space<vmem>>, %arg5: memref<2x32x96xf32, #tpu.memory_space<vmem>>, %arg6: memref<2x1x96xf32, #tpu.memory_space<vmem>>, %arg7: memref<2x32x32xf32, #tpu.memory_space<vmem>>, %arg8: memref<2x1x32xf32, #tpu.memory_space<vmem>>, %arg9: memref<2x1x32xf32, #tpu.memory_space<vmem>>, %arg10: memref<2x1x32xf32, #tpu.memory_space<vmem>>, %arg11: memref<2x32x64xf32, #tpu.memory_space<vmem>>, %arg12: memref<2x1x64xf32, #tpu.memory_space<vmem>>, %arg13: memref<2x64x32xf32, #tpu.memory_space<vmem>>, %arg14: memref<2x1x32xf32, #tpu.memory_space<vmem>>, %arg15: memref<2x1x32xf32, #tpu.memory_space<vmem>>, %arg16: memref<2x1x32xf32, #tpu.memory_space<vmem>>, %arg17: memref<1x16x32xf32, #tpu.memory_space<vmem>>) attributes {dimension_semantics = [#tpu.dimension_semantics<parallel>], iteration_bounds = array<i64: 2>, scalar_prefetch = 0 : i64, scratch_operands = 0 : i64, tpu.core_type = #tpu.core_type<tc>, window_params = [{transform_indices = @transform_0, window_bounds = array<i64: 1, 16, 32>}, {transform_indices = @transform_1, window_bounds = array<i64: 1, 16, 16>}, {pipeline_mode = #tpu.pipeline_mode<synchronous>, transform_indices = @transform_2, window_bounds = array<i64: 1, 32>}, {pipeline_mode = #tpu.pipeline_mode<synchronous>, transform_indices = @transform_3, window_bounds = array<i64: 1, 32>}, {pipeline_mode = #tpu.pipeline_mode<synchronous>, transform_indices = @transform_4, window_bounds = array<i64: 2, 32, 96>}, {pipeline_mode = #tpu.pipeline_mode<synchronous>, transform_indices = @transform_5, window_bounds = array<i64: 2, 1, 96>}, {pipeline_mode = #tpu.pipeline_mode<synchronous>, transform_indices = @transform_6, window_bounds = array<i64: 2, 32, 32>}, {pipeline_mode = #tpu.pipeline_mode<synchronous>, transform_indices = @transform_7, window_bounds = array<i64: 2, 1, 32>}, {pipeline_mode = #tpu.pipeline_mode<synchronous>, transform_indices = @transform_8, window_bounds = array<i64: 2, 1, 32>}, {pipeline_mode = #tpu.pipeline_mode<synchronous>, transform_indices = @transform_9, window_bounds = array<i64: 2, 1, 32>}, {pipeline_mode = #tpu.pipeline_mode<synchronous>, transform_indices = @transform_10, window_bounds = array<i64: 2, 32, 64>}, {pipeline_mode = #tpu.pipeline_mode<synchronous>, transform_indices = @transform_11, window_bounds = array<i64: 2, 1, 64>}, {pipeline_mode = #tpu.pipeline_mode<synchronous>, transform_indices = @transform_12, window_bounds = array<i64: 2, 64, 32>}, {pipeline_mode = #tpu.pipeline_mode<synchronous>, transform_indices = @transform_13, window_bounds = array<i64: 2, 1, 32>}, {pipeline_mode = #tpu.pipeline_mode<synchronous>, transform_indices = @transform_14, window_bounds = array<i64: 2, 1, 32>}, {pipeline_mode = #tpu.pipeline_mode<synchronous>, transform_indices = @transform_15, window_bounds = array<i64: 2, 1, 32>}, {transform_indices = @transform_16, window_bounds = array<i64: 1, 16, 32>}]} {
    %c0 = arith.constant 0 : index
    %c0_0 = arith.constant 0 : index
    %c0_1 = arith.constant 0 : index
    %0 = vector.load %arg2[%c0, %c0_0, %c0_1] : memref<1x16x16xf32, #tpu.memory_space<vmem>>, vector<1x16x16xf32>
    %1 = vector.shape_cast %0 : vector<1x16x16xf32> to vector<16x16xf32>
    %c0_2 = arith.constant 0 : index
    %c0_3 = arith.constant 0 : index
    %c0_4 = arith.constant 0 : index
    %2 = vector.load %arg1[%c0_2, %c0_3, %c0_4] : memref<1x16x32xf32, #tpu.memory_space<vmem>>, vector<1x16x32xf32>
    %3 = vector.shape_cast %2 : vector<1x16x32xf32> to vector<16x32xf32>
    %c0_5 = arith.constant 0 : index
    %c0_6 = arith.constant 0 : index
    %4 = vector.load %arg3[%c0_5, %c0_6] : memref<1x32xf32, #tpu.memory_space<vmem>>, vector<1x32xf32>
    %c0_7 = arith.constant 0 : index
    %c0_8 = arith.constant 0 : index
    %5 = vector.load %arg4[%c0_7, %c0_8] : memref<1x32xf32, #tpu.memory_space<vmem>>, vector<1x32xf32>
    %cst = arith.constant dense<0.000000e+00> : vector<16xf32>
    %6 = vector.multi_reduction <add>, %3, %cst [1] : vector<16x32xf32> to vector<16xf32>
    %7 = vector.shape_cast %6 : vector<16xf32> to vector<16x1xf32>
    %cst_9 = arith.constant 3.200000e+01 : f32
    %8 = vector.broadcast %cst_9 : f32 to vector<16x1xf32>
    %9 = arith.divf %7, %8 : vector<16x1xf32>
    %10 = vector.broadcast %9 : vector<16x1xf32> to vector<16x32xf32>
    %11 = arith.subf %3, %10 : vector<16x32xf32>
    %12 = vector.broadcast %9 : vector<16x1xf32> to vector<16x32xf32>
    %13 = arith.subf %3, %12 : vector<16x32xf32>
    %14 = arith.mulf %11, %13 : vector<16x32xf32>
    %cst_10 = arith.constant dense<0.000000e+00> : vector<16xf32>
    %15 = vector.multi_reduction <add>, %14, %cst_10 [1] : vector<16x32xf32> to vector<16xf32>
    %16 = vector.shape_cast %15 : vector<16xf32> to vector<16x1xf32>
    %cst_11 = arith.constant 3.200000e+01 : f32
    %17 = vector.broadcast %cst_11 : f32 to vector<16x1xf32>
    %18 = arith.divf %16, %17 : vector<16x1xf32>
    %19 = vector.broadcast %9 : vector<16x1xf32> to vector<16x32xf32>
    %20 = arith.subf %3, %19 : vector<16x32xf32>
    %cst_12 = arith.constant 9.99999974E-6 : f32
    %21 = vector.broadcast %cst_12 : f32 to vector<16x1xf32>
    %22 = arith.addf %18, %21 : vector<16x1xf32>
    %23 = math.rsqrt %22 : vector<16x1xf32>
    %24 = vector.broadcast %23 : vector<16x1xf32> to vector<16x32xf32>
    %25 = arith.mulf %20, %24 : vector<16x32xf32>
    %26 = vector.broadcast %4 : vector<1x32xf32> to vector<16x32xf32>
    %27 = arith.mulf %25, %26 : vector<16x32xf32>
    %28 = vector.broadcast %5 : vector<1x32xf32> to vector<16x32xf32>
    %29 = arith.addf %27, %28 : vector<16x32xf32>
    %c0_13 = arith.constant 0 : index
    %c0_14 = arith.constant 0 : index
    %c0_15 = arith.constant 0 : index
    %30 = vector.load %arg5[%c0_13, %c0_14, %c0_15] : memref<2x32x96xf32, #tpu.memory_space<vmem>>, vector<1x32x96xf32>
    %31 = vector.shape_cast %30 : vector<1x32x96xf32> to vector<32x96xf32>
    %cst_16 = arith.constant dense<0.000000e+00> : vector<16x96xf32>
    %32 = tpu.matmul %29, %31, %cst_16 {dimension_numbers = #tpu.dot_dimension_numbers<[1], [0], [0], [1], [0, 0, 1, 1], [], []>} : vector<16x32xf32>, vector<32x96xf32>, vector<16x96xf32> -> vector<16x96xf32>
    %c0_17 = arith.constant 0 : index
    %c0_18 = arith.constant 0 : index
    %c0_19 = arith.constant 0 : index
    %33 = vector.load %arg6[%c0_17, %c0_18, %c0_19] : memref<2x1x96xf32, #tpu.memory_space<vmem>>, vector<1x1x96xf32>
    %34 = vector.shape_cast %33 : vector<1x1x96xf32> to vector<1x96xf32>
    %35 = vector.broadcast %34 : vector<1x96xf32> to vector<16x96xf32>
    %36 = arith.addf %32, %35 : vector<16x96xf32>
    %c0_20 = arith.constant 0 : index
    %c0_21 = arith.constant 0 : index
    %c0_22 = arith.constant 0 : index
    %37 = vector.load %arg7[%c0_20, %c0_21, %c0_22] : memref<2x32x32xf32, #tpu.memory_space<vmem>>, vector<1x32x32xf32>
    %38 = vector.shape_cast %37 : vector<1x32x32xf32> to vector<32x32xf32>
    %c0_23 = arith.constant 0 : index
    %c0_24 = arith.constant 0 : index
    %c0_25 = arith.constant 0 : index
    %39 = vector.load %arg8[%c0_23, %c0_24, %c0_25] : memref<2x1x32xf32, #tpu.memory_space<vmem>>, vector<1x1x32xf32>
    %40 = vector.shape_cast %39 : vector<1x1x32xf32> to vector<1x32xf32>
    %41 = vector.extract_strided_slice %36 {offsets = [0, 0], sizes = [16, 8], strides = [1, 1]} : vector<16x96xf32> to vector<16x8xf32>
    %42 = vector.extract_strided_slice %36 {offsets = [0, 32], sizes = [16, 8], strides = [1, 1]} : vector<16x96xf32> to vector<16x8xf32>
    %43 = vector.extract_strided_slice %36 {offsets = [0, 64], sizes = [16, 8], strides = [1, 1]} : vector<16x96xf32> to vector<16x8xf32>
    %cst_26 = arith.constant dense<0.000000e+00> : vector<16x16xf32>
    %44 = tpu.matmul %41, %42, %cst_26 {dimension_numbers = #tpu.dot_dimension_numbers<[1], [1], [0], [0], [0, 0, 1, 0], [], []>} : vector<16x8xf32>, vector<16x8xf32>, vector<16x16xf32> -> vector<16x16xf32>
    %cst_27 = arith.constant 0.353553385 : f32
    %45 = vector.broadcast %cst_27 : f32 to vector<16x16xf32>
    %46 = arith.mulf %44, %45 : vector<16x16xf32>
    %47 = arith.addf %46, %1 : vector<16x16xf32>
    %cst_28 = arith.constant dense<0xFF800000> : vector<16xf32>
    %48 = vector.multi_reduction <maximumf>, %47, %cst_28 [1] : vector<16x16xf32> to vector<16xf32>
    %49 = vector.shape_cast %48 : vector<16xf32> to vector<16x1xf32>
    %50 = vector.broadcast %49 : vector<16x1xf32> to vector<16x16xf32>
    %51 = arith.subf %47, %50 : vector<16x16xf32>
    %52 = math.exp %51 : vector<16x16xf32>
    %cst_29 = arith.constant dense<0.000000e+00> : vector<16xf32>
    %53 = vector.multi_reduction <add>, %52, %cst_29 [1] : vector<16x16xf32> to vector<16xf32>
    %54 = vector.shape_cast %53 : vector<16xf32> to vector<16x1xf32>
    %55 = vector.broadcast %54 : vector<16x1xf32> to vector<16x16xf32>
    %56 = arith.divf %52, %55 : vector<16x16xf32>
    %cst_30 = arith.constant dense<0.000000e+00> : vector<16x8xf32>
    %57 = tpu.matmul %56, %43, %cst_30 {dimension_numbers = #tpu.dot_dimension_numbers<[1], [0], [0], [1], [0, 0, 1, 1], [], []>} : vector<16x16xf32>, vector<16x8xf32>, vector<16x8xf32> -> vector<16x8xf32>
    %58 = vector.extract_strided_slice %38 {offsets = [0, 0], sizes = [8, 32], strides = [1, 1]} : vector<32x32xf32> to vector<8x32xf32>
    %cst_31 = arith.constant dense<0.000000e+00> : vector<16x32xf32>
    %59 = tpu.matmul %57, %58, %cst_31 {dimension_numbers = #tpu.dot_dimension_numbers<[1], [0], [0], [1], [0, 0, 1, 1], [], []>} : vector<16x8xf32>, vector<8x32xf32>, vector<16x32xf32> -> vector<16x32xf32>
    %60 = vector.broadcast %40 : vector<1x32xf32> to vector<16x32xf32>
    %61 = arith.addf %60, %59 : vector<16x32xf32>
    %62 = vector.extract_strided_slice %36 {offsets = [0, 8], sizes = [16, 8], strides = [1, 1]} : vector<16x96xf32> to vector<16x8xf32>
    %63 = vector.extract_strided_slice %36 {offsets = [0, 40], sizes = [16, 8], strides = [1, 1]} : vector<16x96xf32> to vector<16x8xf32>
    %64 = vector.extract_strided_slice %36 {offsets = [0, 72], sizes = [16, 8], strides = [1, 1]} : vector<16x96xf32> to vector<16x8xf32>
    %cst_32 = arith.constant dense<0.000000e+00> : vector<16x16xf32>
    %65 = tpu.matmul %62, %63, %cst_32 {dimension_numbers = #tpu.dot_dimension_numbers<[1], [1], [0], [0], [0, 0, 1, 0], [], []>} : vector<16x8xf32>, vector<16x8xf32>, vector<16x16xf32> -> vector<16x16xf32>
    %cst_33 = arith.constant 0.353553385 : f32
    %66 = vector.broadcast %cst_33 : f32 to vector<16x16xf32>
    %67 = arith.mulf %65, %66 : vector<16x16xf32>
    %68 = arith.addf %67, %1 : vector<16x16xf32>
    %cst_34 = arith.constant dense<0xFF800000> : vector<16xf32>
    %69 = vector.multi_reduction <maximumf>, %68, %cst_34 [1] : vector<16x16xf32> to vector<16xf32>
    %70 = vector.shape_cast %69 : vector<16xf32> to vector<16x1xf32>
    %71 = vector.broadcast %70 : vector<16x1xf32> to vector<16x16xf32>
    %72 = arith.subf %68, %71 : vector<16x16xf32>
    %73 = math.exp %72 : vector<16x16xf32>
    %cst_35 = arith.constant dense<0.000000e+00> : vector<16xf32>
    %74 = vector.multi_reduction <add>, %73, %cst_35 [1] : vector<16x16xf32> to vector<16xf32>
    %75 = vector.shape_cast %74 : vector<16xf32> to vector<16x1xf32>
    %76 = vector.broadcast %75 : vector<16x1xf32> to vector<16x16xf32>
    %77 = arith.divf %73, %76 : vector<16x16xf32>
    %cst_36 = arith.constant dense<0.000000e+00> : vector<16x8xf32>
    %78 = tpu.matmul %77, %64, %cst_36 {dimension_numbers = #tpu.dot_dimension_numbers<[1], [0], [0], [1], [0, 0, 1, 1], [], []>} : vector<16x16xf32>, vector<16x8xf32>, vector<16x8xf32> -> vector<16x8xf32>
    %79 = vector.extract_strided_slice %38 {offsets = [8, 0], sizes = [8, 32], strides = [1, 1]} : vector<32x32xf32> to vector<8x32xf32>
    %cst_37 = arith.constant dense<0.000000e+00> : vector<16x32xf32>
    %80 = tpu.matmul %78, %79, %cst_37 {dimension_numbers = #tpu.dot_dimension_numbers<[1], [0], [0], [1], [0, 0, 1, 1], [], []>} : vector<16x8xf32>, vector<8x32xf32>, vector<16x32xf32> -> vector<16x32xf32>
    %81 = arith.addf %61, %80 : vector<16x32xf32>
    %82 = vector.extract_strided_slice %36 {offsets = [0, 16], sizes = [16, 8], strides = [1, 1]} : vector<16x96xf32> to vector<16x8xf32>
    %83 = vector.extract_strided_slice %36 {offsets = [0, 48], sizes = [16, 8], strides = [1, 1]} : vector<16x96xf32> to vector<16x8xf32>
    %84 = vector.extract_strided_slice %36 {offsets = [0, 80], sizes = [16, 8], strides = [1, 1]} : vector<16x96xf32> to vector<16x8xf32>
    %cst_38 = arith.constant dense<0.000000e+00> : vector<16x16xf32>
    %85 = tpu.matmul %82, %83, %cst_38 {dimension_numbers = #tpu.dot_dimension_numbers<[1], [1], [0], [0], [0, 0, 1, 0], [], []>} : vector<16x8xf32>, vector<16x8xf32>, vector<16x16xf32> -> vector<16x16xf32>
    %cst_39 = arith.constant 0.353553385 : f32
    %86 = vector.broadcast %cst_39 : f32 to vector<16x16xf32>
    %87 = arith.mulf %85, %86 : vector<16x16xf32>
    %88 = arith.addf %87, %1 : vector<16x16xf32>
    %cst_40 = arith.constant dense<0xFF800000> : vector<16xf32>
    %89 = vector.multi_reduction <maximumf>, %88, %cst_40 [1] : vector<16x16xf32> to vector<16xf32>
    %90 = vector.shape_cast %89 : vector<16xf32> to vector<16x1xf32>
    %91 = vector.broadcast %90 : vector<16x1xf32> to vector<16x16xf32>
    %92 = arith.subf %88, %91 : vector<16x16xf32>
    %93 = math.exp %92 : vector<16x16xf32>
    %cst_41 = arith.constant dense<0.000000e+00> : vector<16xf32>
    %94 = vector.multi_reduction <add>, %93, %cst_41 [1] : vector<16x16xf32> to vector<16xf32>
    %95 = vector.shape_cast %94 : vector<16xf32> to vector<16x1xf32>
    %96 = vector.broadcast %95 : vector<16x1xf32> to vector<16x16xf32>
    %97 = arith.divf %93, %96 : vector<16x16xf32>
    %cst_42 = arith.constant dense<0.000000e+00> : vector<16x8xf32>
    %98 = tpu.matmul %97, %84, %cst_42 {dimension_numbers = #tpu.dot_dimension_numbers<[1], [0], [0], [1], [0, 0, 1, 1], [], []>} : vector<16x16xf32>, vector<16x8xf32>, vector<16x8xf32> -> vector<16x8xf32>
    %99 = vector.extract_strided_slice %38 {offsets = [16, 0], sizes = [8, 32], strides = [1, 1]} : vector<32x32xf32> to vector<8x32xf32>
    %cst_43 = arith.constant dense<0.000000e+00> : vector<16x32xf32>
    %100 = tpu.matmul %98, %99, %cst_43 {dimension_numbers = #tpu.dot_dimension_numbers<[1], [0], [0], [1], [0, 0, 1, 1], [], []>} : vector<16x8xf32>, vector<8x32xf32>, vector<16x32xf32> -> vector<16x32xf32>
    %101 = arith.addf %81, %100 : vector<16x32xf32>
    %102 = vector.extract_strided_slice %36 {offsets = [0, 24], sizes = [16, 8], strides = [1, 1]} : vector<16x96xf32> to vector<16x8xf32>
    %103 = vector.extract_strided_slice %36 {offsets = [0, 56], sizes = [16, 8], strides = [1, 1]} : vector<16x96xf32> to vector<16x8xf32>
    %104 = vector.extract_strided_slice %36 {offsets = [0, 88], sizes = [16, 8], strides = [1, 1]} : vector<16x96xf32> to vector<16x8xf32>
    %cst_44 = arith.constant dense<0.000000e+00> : vector<16x16xf32>
    %105 = tpu.matmul %102, %103, %cst_44 {dimension_numbers = #tpu.dot_dimension_numbers<[1], [1], [0], [0], [0, 0, 1, 0], [], []>} : vector<16x8xf32>, vector<16x8xf32>, vector<16x16xf32> -> vector<16x16xf32>
    %cst_45 = arith.constant 0.353553385 : f32
    %106 = vector.broadcast %cst_45 : f32 to vector<16x16xf32>
    %107 = arith.mulf %105, %106 : vector<16x16xf32>
    %108 = arith.addf %107, %1 : vector<16x16xf32>
    %cst_46 = arith.constant dense<0xFF800000> : vector<16xf32>
    %109 = vector.multi_reduction <maximumf>, %108, %cst_46 [1] : vector<16x16xf32> to vector<16xf32>
    %110 = vector.shape_cast %109 : vector<16xf32> to vector<16x1xf32>
    %111 = vector.broadcast %110 : vector<16x1xf32> to vector<16x16xf32>
    %112 = arith.subf %108, %111 : vector<16x16xf32>
    %113 = math.exp %112 : vector<16x16xf32>
    %cst_47 = arith.constant dense<0.000000e+00> : vector<16xf32>
    %114 = vector.multi_reduction <add>, %113, %cst_47 [1] : vector<16x16xf32> to vector<16xf32>
    %115 = vector.shape_cast %114 : vector<16xf32> to vector<16x1xf32>
    %116 = vector.broadcast %115 : vector<16x1xf32> to vector<16x16xf32>
    %117 = arith.divf %113, %116 : vector<16x16xf32>
    %cst_48 = arith.constant dense<0.000000e+00> : vector<16x8xf32>
    %118 = tpu.matmul %117, %104, %cst_48 {dimension_numbers = #tpu.dot_dimension_numbers<[1], [0], [0], [1], [0, 0, 1, 1], [], []>} : vector<16x16xf32>, vector<16x8xf32>, vector<16x8xf32> -> vector<16x8xf32>
    %119 = vector.extract_strided_slice %38 {offsets = [24, 0], sizes = [8, 32], strides = [1, 1]} : vector<32x32xf32> to vector<8x32xf32>
    %cst_49 = arith.constant dense<0.000000e+00> : vector<16x32xf32>
    %120 = tpu.matmul %118, %119, %cst_49 {dimension_numbers = #tpu.dot_dimension_numbers<[1], [0], [0], [1], [0, 0, 1, 1], [], []>} : vector<16x8xf32>, vector<8x32xf32>, vector<16x32xf32> -> vector<16x32xf32>
    %121 = arith.addf %101, %120 : vector<16x32xf32>
    %122 = arith.addf %121, %29 : vector<16x32xf32>
    %c0_50 = arith.constant 0 : index
    %c0_51 = arith.constant 0 : index
    %c0_52 = arith.constant 0 : index
    %123 = vector.load %arg9[%c0_50, %c0_51, %c0_52] : memref<2x1x32xf32, #tpu.memory_space<vmem>>, vector<1x1x32xf32>
    %124 = vector.shape_cast %123 : vector<1x1x32xf32> to vector<1x32xf32>
    %c0_53 = arith.constant 0 : index
    %c0_54 = arith.constant 0 : index
    %c0_55 = arith.constant 0 : index
    %125 = vector.load %arg10[%c0_53, %c0_54, %c0_55] : memref<2x1x32xf32, #tpu.memory_space<vmem>>, vector<1x1x32xf32>
    %126 = vector.shape_cast %125 : vector<1x1x32xf32> to vector<1x32xf32>
    %cst_56 = arith.constant dense<0.000000e+00> : vector<16xf32>
    %127 = vector.multi_reduction <add>, %122, %cst_56 [1] : vector<16x32xf32> to vector<16xf32>
    %128 = vector.shape_cast %127 : vector<16xf32> to vector<16x1xf32>
    %cst_57 = arith.constant 3.200000e+01 : f32
    %129 = vector.broadcast %cst_57 : f32 to vector<16x1xf32>
    %130 = arith.divf %128, %129 : vector<16x1xf32>
    %131 = vector.broadcast %130 : vector<16x1xf32> to vector<16x32xf32>
    %132 = arith.subf %122, %131 : vector<16x32xf32>
    %133 = vector.broadcast %130 : vector<16x1xf32> to vector<16x32xf32>
    %134 = arith.subf %122, %133 : vector<16x32xf32>
    %135 = arith.mulf %132, %134 : vector<16x32xf32>
    %cst_58 = arith.constant dense<0.000000e+00> : vector<16xf32>
    %136 = vector.multi_reduction <add>, %135, %cst_58 [1] : vector<16x32xf32> to vector<16xf32>
    %137 = vector.shape_cast %136 : vector<16xf32> to vector<16x1xf32>
    %cst_59 = arith.constant 3.200000e+01 : f32
    %138 = vector.broadcast %cst_59 : f32 to vector<16x1xf32>
    %139 = arith.divf %137, %138 : vector<16x1xf32>
    %140 = vector.broadcast %130 : vector<16x1xf32> to vector<16x32xf32>
    %141 = arith.subf %122, %140 : vector<16x32xf32>
    %cst_60 = arith.constant 9.99999974E-6 : f32
    %142 = vector.broadcast %cst_60 : f32 to vector<16x1xf32>
    %143 = arith.addf %139, %142 : vector<16x1xf32>
    %144 = math.rsqrt %143 : vector<16x1xf32>
    %145 = vector.broadcast %144 : vector<16x1xf32> to vector<16x32xf32>
    %146 = arith.mulf %141, %145 : vector<16x32xf32>
    %147 = vector.broadcast %124 : vector<1x32xf32> to vector<16x32xf32>
    %148 = arith.mulf %146, %147 : vector<16x32xf32>
    %149 = vector.broadcast %126 : vector<1x32xf32> to vector<16x32xf32>
    %150 = arith.addf %148, %149 : vector<16x32xf32>
    %c0_61 = arith.constant 0 : index
    %c0_62 = arith.constant 0 : index
    %c0_63 = arith.constant 0 : index
    %151 = vector.load %arg11[%c0_61, %c0_62, %c0_63] : memref<2x32x64xf32, #tpu.memory_space<vmem>>, vector<1x32x64xf32>
    %152 = vector.shape_cast %151 : vector<1x32x64xf32> to vector<32x64xf32>
    %cst_64 = arith.constant dense<0.000000e+00> : vector<16x64xf32>
    %153 = tpu.matmul %150, %152, %cst_64 {dimension_numbers = #tpu.dot_dimension_numbers<[1], [0], [0], [1], [0, 0, 1, 1], [], []>} : vector<16x32xf32>, vector<32x64xf32>, vector<16x64xf32> -> vector<16x64xf32>
    %c0_65 = arith.constant 0 : index
    %c0_66 = arith.constant 0 : index
    %c0_67 = arith.constant 0 : index
    %154 = vector.load %arg12[%c0_65, %c0_66, %c0_67] : memref<2x1x64xf32, #tpu.memory_space<vmem>>, vector<1x1x64xf32>
    %155 = vector.shape_cast %154 : vector<1x1x64xf32> to vector<1x64xf32>
    %156 = vector.broadcast %155 : vector<1x64xf32> to vector<16x64xf32>
    %157 = arith.addf %153, %156 : vector<16x64xf32>
    %cst_68 = arith.constant 5.000000e-01 : f32
    %158 = vector.broadcast %cst_68 : f32 to vector<16x64xf32>
    %159 = arith.mulf %158, %157 : vector<16x64xf32>
    %cst_69 = arith.constant 4.471500e-02 : f32
    %160 = vector.broadcast %cst_69 : f32 to vector<16x64xf32>
    %161 = arith.mulf %160, %157 : vector<16x64xf32>
    %162 = arith.mulf %161, %157 : vector<16x64xf32>
    %163 = arith.mulf %162, %157 : vector<16x64xf32>
    %164 = arith.addf %157, %163 : vector<16x64xf32>
    %cst_70 = arith.constant 0.797884583 : f32
    %165 = vector.broadcast %cst_70 : f32 to vector<16x64xf32>
    %166 = arith.mulf %165, %164 : vector<16x64xf32>
    %167 = math.tanh %166 : vector<16x64xf32>
    %cst_71 = arith.constant 1.000000e+00 : f32
    %168 = vector.broadcast %cst_71 : f32 to vector<16x64xf32>
    %169 = arith.addf %168, %167 : vector<16x64xf32>
    %170 = arith.mulf %159, %169 : vector<16x64xf32>
    %c0_72 = arith.constant 0 : index
    %c0_73 = arith.constant 0 : index
    %c0_74 = arith.constant 0 : index
    %171 = vector.load %arg13[%c0_72, %c0_73, %c0_74] : memref<2x64x32xf32, #tpu.memory_space<vmem>>, vector<1x64x32xf32>
    %172 = vector.shape_cast %171 : vector<1x64x32xf32> to vector<64x32xf32>
    %cst_75 = arith.constant dense<0.000000e+00> : vector<16x32xf32>
    %173 = tpu.matmul %170, %172, %cst_75 {dimension_numbers = #tpu.dot_dimension_numbers<[1], [0], [0], [1], [0, 0, 1, 1], [], []>} : vector<16x64xf32>, vector<64x32xf32>, vector<16x32xf32> -> vector<16x32xf32>
    %c0_76 = arith.constant 0 : index
    %c0_77 = arith.constant 0 : index
    %c0_78 = arith.constant 0 : index
    %174 = vector.load %arg14[%c0_76, %c0_77, %c0_78] : memref<2x1x32xf32, #tpu.memory_space<vmem>>, vector<1x1x32xf32>
    %175 = vector.shape_cast %174 : vector<1x1x32xf32> to vector<1x32xf32>
    %176 = vector.broadcast %175 : vector<1x32xf32> to vector<16x32xf32>
    %177 = arith.addf %173, %176 : vector<16x32xf32>
    %178 = arith.addf %177, %150 : vector<16x32xf32>
    %c0_79 = arith.constant 0 : index
    %c0_80 = arith.constant 0 : index
    %c0_81 = arith.constant 0 : index
    %179 = vector.load %arg15[%c0_79, %c0_80, %c0_81] : memref<2x1x32xf32, #tpu.memory_space<vmem>>, vector<1x1x32xf32>
    %180 = vector.shape_cast %179 : vector<1x1x32xf32> to vector<1x32xf32>
    %c0_82 = arith.constant 0 : index
    %c0_83 = arith.constant 0 : index
    %c0_84 = arith.constant 0 : index
    %181 = vector.load %arg16[%c0_82, %c0_83, %c0_84] : memref<2x1x32xf32, #tpu.memory_space<vmem>>, vector<1x1x32xf32>
    %182 = vector.shape_cast %181 : vector<1x1x32xf32> to vector<1x32xf32>
    %cst_85 = arith.constant dense<0.000000e+00> : vector<16xf32>
    %183 = vector.multi_reduction <add>, %178, %cst_85 [1] : vector<16x32xf32> to vector<16xf32>
    %184 = vector.shape_cast %183 : vector<16xf32> to vector<16x1xf32>
    %cst_86 = arith.constant 3.200000e+01 : f32
    %185 = vector.broadcast %cst_86 : f32 to vector<16x1xf32>
    %186 = arith.divf %184, %185 : vector<16x1xf32>
    %187 = vector.broadcast %186 : vector<16x1xf32> to vector<16x32xf32>
    %188 = arith.subf %178, %187 : vector<16x32xf32>
    %189 = vector.broadcast %186 : vector<16x1xf32> to vector<16x32xf32>
    %190 = arith.subf %178, %189 : vector<16x32xf32>
    %191 = arith.mulf %188, %190 : vector<16x32xf32>
    %cst_87 = arith.constant dense<0.000000e+00> : vector<16xf32>
    %192 = vector.multi_reduction <add>, %191, %cst_87 [1] : vector<16x32xf32> to vector<16xf32>
    %193 = vector.shape_cast %192 : vector<16xf32> to vector<16x1xf32>
    %cst_88 = arith.constant 3.200000e+01 : f32
    %194 = vector.broadcast %cst_88 : f32 to vector<16x1xf32>
    %195 = arith.divf %193, %194 : vector<16x1xf32>
    %196 = vector.broadcast %186 : vector<16x1xf32> to vector<16x32xf32>
    %197 = arith.subf %178, %196 : vector<16x32xf32>
    %cst_89 = arith.constant 9.99999974E-6 : f32
    %198 = vector.broadcast %cst_89 : f32 to vector<16x1xf32>
    %199 = arith.addf %195, %198 : vector<16x1xf32>
    %200 = math.rsqrt %199 : vector<16x1xf32>
    %201 = vector.broadcast %200 : vector<16x1xf32> to vector<16x32xf32>
    %202 = arith.mulf %197, %201 : vector<16x32xf32>
    %203 = vector.broadcast %180 : vector<1x32xf32> to vector<16x32xf32>
    %204 = arith.mulf %202, %203 : vector<16x32xf32>
    %205 = vector.broadcast %182 : vector<1x32xf32> to vector<16x32xf32>
    %206 = arith.addf %204, %205 : vector<16x32xf32>
    %c1 = arith.constant 1 : index
    %c0_90 = arith.constant 0 : index
    %c0_91 = arith.constant 0 : index
    %207 = vector.load %arg5[%c1, %c0_90, %c0_91] : memref<2x32x96xf32, #tpu.memory_space<vmem>>, vector<1x32x96xf32>
    %208 = vector.shape_cast %207 : vector<1x32x96xf32> to vector<32x96xf32>
    %cst_92 = arith.constant dense<0.000000e+00> : vector<16x96xf32>
    %209 = tpu.matmul %206, %208, %cst_92 {dimension_numbers = #tpu.dot_dimension_numbers<[1], [0], [0], [1], [0, 0, 1, 1], [], []>} : vector<16x32xf32>, vector<32x96xf32>, vector<16x96xf32> -> vector<16x96xf32>
    %c1_93 = arith.constant 1 : index
    %c0_94 = arith.constant 0 : index
    %c0_95 = arith.constant 0 : index
    %210 = vector.load %arg6[%c1_93, %c0_94, %c0_95] : memref<2x1x96xf32, #tpu.memory_space<vmem>>, vector<1x1x96xf32>
    %211 = vector.shape_cast %210 : vector<1x1x96xf32> to vector<1x96xf32>
    %212 = vector.broadcast %211 : vector<1x96xf32> to vector<16x96xf32>
    %213 = arith.addf %209, %212 : vector<16x96xf32>
    %c1_96 = arith.constant 1 : index
    %c0_97 = arith.constant 0 : index
    %c0_98 = arith.constant 0 : index
    %214 = vector.load %arg7[%c1_96, %c0_97, %c0_98] : memref<2x32x32xf32, #tpu.memory_space<vmem>>, vector<1x32x32xf32>
    %215 = vector.shape_cast %214 : vector<1x32x32xf32> to vector<32x32xf32>
    %c1_99 = arith.constant 1 : index
    %c0_100 = arith.constant 0 : index
    %c0_101 = arith.constant 0 : index
    %216 = vector.load %arg8[%c1_99, %c0_100, %c0_101] : memref<2x1x32xf32, #tpu.memory_space<vmem>>, vector<1x1x32xf32>
    %217 = vector.shape_cast %216 : vector<1x1x32xf32> to vector<1x32xf32>
    %218 = vector.extract_strided_slice %213 {offsets = [0, 0], sizes = [16, 8], strides = [1, 1]} : vector<16x96xf32> to vector<16x8xf32>
    %219 = vector.extract_strided_slice %213 {offsets = [0, 32], sizes = [16, 8], strides = [1, 1]} : vector<16x96xf32> to vector<16x8xf32>
    %220 = vector.extract_strided_slice %213 {offsets = [0, 64], sizes = [16, 8], strides = [1, 1]} : vector<16x96xf32> to vector<16x8xf32>
    %cst_102 = arith.constant dense<0.000000e+00> : vector<16x16xf32>
    %221 = tpu.matmul %218, %219, %cst_102 {dimension_numbers = #tpu.dot_dimension_numbers<[1], [1], [0], [0], [0, 0, 1, 0], [], []>} : vector<16x8xf32>, vector<16x8xf32>, vector<16x16xf32> -> vector<16x16xf32>
    %cst_103 = arith.constant 0.353553385 : f32
    %222 = vector.broadcast %cst_103 : f32 to vector<16x16xf32>
    %223 = arith.mulf %221, %222 : vector<16x16xf32>
    %224 = arith.addf %223, %1 : vector<16x16xf32>
    %cst_104 = arith.constant dense<0xFF800000> : vector<16xf32>
    %225 = vector.multi_reduction <maximumf>, %224, %cst_104 [1] : vector<16x16xf32> to vector<16xf32>
    %226 = vector.shape_cast %225 : vector<16xf32> to vector<16x1xf32>
    %227 = vector.broadcast %226 : vector<16x1xf32> to vector<16x16xf32>
    %228 = arith.subf %224, %227 : vector<16x16xf32>
    %229 = math.exp %228 : vector<16x16xf32>
    %cst_105 = arith.constant dense<0.000000e+00> : vector<16xf32>
    %230 = vector.multi_reduction <add>, %229, %cst_105 [1] : vector<16x16xf32> to vector<16xf32>
    %231 = vector.shape_cast %230 : vector<16xf32> to vector<16x1xf32>
    %232 = vector.broadcast %231 : vector<16x1xf32> to vector<16x16xf32>
    %233 = arith.divf %229, %232 : vector<16x16xf32>
    %cst_106 = arith.constant dense<0.000000e+00> : vector<16x8xf32>
    %234 = tpu.matmul %233, %220, %cst_106 {dimension_numbers = #tpu.dot_dimension_numbers<[1], [0], [0], [1], [0, 0, 1, 1], [], []>} : vector<16x16xf32>, vector<16x8xf32>, vector<16x8xf32> -> vector<16x8xf32>
    %235 = vector.extract_strided_slice %215 {offsets = [0, 0], sizes = [8, 32], strides = [1, 1]} : vector<32x32xf32> to vector<8x32xf32>
    %cst_107 = arith.constant dense<0.000000e+00> : vector<16x32xf32>
    %236 = tpu.matmul %234, %235, %cst_107 {dimension_numbers = #tpu.dot_dimension_numbers<[1], [0], [0], [1], [0, 0, 1, 1], [], []>} : vector<16x8xf32>, vector<8x32xf32>, vector<16x32xf32> -> vector<16x32xf32>
    %237 = vector.broadcast %217 : vector<1x32xf32> to vector<16x32xf32>
    %238 = arith.addf %237, %236 : vector<16x32xf32>
    %239 = vector.extract_strided_slice %213 {offsets = [0, 8], sizes = [16, 8], strides = [1, 1]} : vector<16x96xf32> to vector<16x8xf32>
    %240 = vector.extract_strided_slice %213 {offsets = [0, 40], sizes = [16, 8], strides = [1, 1]} : vector<16x96xf32> to vector<16x8xf32>
    %241 = vector.extract_strided_slice %213 {offsets = [0, 72], sizes = [16, 8], strides = [1, 1]} : vector<16x96xf32> to vector<16x8xf32>
    %cst_108 = arith.constant dense<0.000000e+00> : vector<16x16xf32>
    %242 = tpu.matmul %239, %240, %cst_108 {dimension_numbers = #tpu.dot_dimension_numbers<[1], [1], [0], [0], [0, 0, 1, 0], [], []>} : vector<16x8xf32>, vector<16x8xf32>, vector<16x16xf32> -> vector<16x16xf32>
    %cst_109 = arith.constant 0.353553385 : f32
    %243 = vector.broadcast %cst_109 : f32 to vector<16x16xf32>
    %244 = arith.mulf %242, %243 : vector<16x16xf32>
    %245 = arith.addf %244, %1 : vector<16x16xf32>
    %cst_110 = arith.constant dense<0xFF800000> : vector<16xf32>
    %246 = vector.multi_reduction <maximumf>, %245, %cst_110 [1] : vector<16x16xf32> to vector<16xf32>
    %247 = vector.shape_cast %246 : vector<16xf32> to vector<16x1xf32>
    %248 = vector.broadcast %247 : vector<16x1xf32> to vector<16x16xf32>
    %249 = arith.subf %245, %248 : vector<16x16xf32>
    %250 = math.exp %249 : vector<16x16xf32>
    %cst_111 = arith.constant dense<0.000000e+00> : vector<16xf32>
    %251 = vector.multi_reduction <add>, %250, %cst_111 [1] : vector<16x16xf32> to vector<16xf32>
    %252 = vector.shape_cast %251 : vector<16xf32> to vector<16x1xf32>
    %253 = vector.broadcast %252 : vector<16x1xf32> to vector<16x16xf32>
    %254 = arith.divf %250, %253 : vector<16x16xf32>
    %cst_112 = arith.constant dense<0.000000e+00> : vector<16x8xf32>
    %255 = tpu.matmul %254, %241, %cst_112 {dimension_numbers = #tpu.dot_dimension_numbers<[1], [0], [0], [1], [0, 0, 1, 1], [], []>} : vector<16x16xf32>, vector<16x8xf32>, vector<16x8xf32> -> vector<16x8xf32>
    %256 = vector.extract_strided_slice %215 {offsets = [8, 0], sizes = [8, 32], strides = [1, 1]} : vector<32x32xf32> to vector<8x32xf32>
    %cst_113 = arith.constant dense<0.000000e+00> : vector<16x32xf32>
    %257 = tpu.matmul %255, %256, %cst_113 {dimension_numbers = #tpu.dot_dimension_numbers<[1], [0], [0], [1], [0, 0, 1, 1], [], []>} : vector<16x8xf32>, vector<8x32xf32>, vector<16x32xf32> -> vector<16x32xf32>
    %258 = arith.addf %238, %257 : vector<16x32xf32>
    %259 = vector.extract_strided_slice %213 {offsets = [0, 16], sizes = [16, 8], strides = [1, 1]} : vector<16x96xf32> to vector<16x8xf32>
    %260 = vector.extract_strided_slice %213 {offsets = [0, 48], sizes = [16, 8], strides = [1, 1]} : vector<16x96xf32> to vector<16x8xf32>
    %261 = vector.extract_strided_slice %213 {offsets = [0, 80], sizes = [16, 8], strides = [1, 1]} : vector<16x96xf32> to vector<16x8xf32>
    %cst_114 = arith.constant dense<0.000000e+00> : vector<16x16xf32>
    %262 = tpu.matmul %259, %260, %cst_114 {dimension_numbers = #tpu.dot_dimension_numbers<[1], [1], [0], [0], [0, 0, 1, 0], [], []>} : vector<16x8xf32>, vector<16x8xf32>, vector<16x16xf32> -> vector<16x16xf32>
    %cst_115 = arith.constant 0.353553385 : f32
    %263 = vector.broadcast %cst_115 : f32 to vector<16x16xf32>
    %264 = arith.mulf %262, %263 : vector<16x16xf32>
    %265 = arith.addf %264, %1 : vector<16x16xf32>
    %cst_116 = arith.constant dense<0xFF800000> : vector<16xf32>
    %266 = vector.multi_reduction <maximumf>, %265, %cst_116 [1] : vector<16x16xf32> to vector<16xf32>
    %267 = vector.shape_cast %266 : vector<16xf32> to vector<16x1xf32>
    %268 = vector.broadcast %267 : vector<16x1xf32> to vector<16x16xf32>
    %269 = arith.subf %265, %268 : vector<16x16xf32>
    %270 = math.exp %269 : vector<16x16xf32>
    %cst_117 = arith.constant dense<0.000000e+00> : vector<16xf32>
    %271 = vector.multi_reduction <add>, %270, %cst_117 [1] : vector<16x16xf32> to vector<16xf32>
    %272 = vector.shape_cast %271 : vector<16xf32> to vector<16x1xf32>
    %273 = vector.broadcast %272 : vector<16x1xf32> to vector<16x16xf32>
    %274 = arith.divf %270, %273 : vector<16x16xf32>
    %cst_118 = arith.constant dense<0.000000e+00> : vector<16x8xf32>
    %275 = tpu.matmul %274, %261, %cst_118 {dimension_numbers = #tpu.dot_dimension_numbers<[1], [0], [0], [1], [0, 0, 1, 1], [], []>} : vector<16x16xf32>, vector<16x8xf32>, vector<16x8xf32> -> vector<16x8xf32>
    %276 = vector.extract_strided_slice %215 {offsets = [16, 0], sizes = [8, 32], strides = [1, 1]} : vector<32x32xf32> to vector<8x32xf32>
    %cst_119 = arith.constant dense<0.000000e+00> : vector<16x32xf32>
    %277 = tpu.matmul %275, %276, %cst_119 {dimension_numbers = #tpu.dot_dimension_numbers<[1], [0], [0], [1], [0, 0, 1, 1], [], []>} : vector<16x8xf32>, vector<8x32xf32>, vector<16x32xf32> -> vector<16x32xf32>
    %278 = arith.addf %258, %277 : vector<16x32xf32>
    %279 = vector.extract_strided_slice %213 {offsets = [0, 24], sizes = [16, 8], strides = [1, 1]} : vector<16x96xf32> to vector<16x8xf32>
    %280 = vector.extract_strided_slice %213 {offsets = [0, 56], sizes = [16, 8], strides = [1, 1]} : vector<16x96xf32> to vector<16x8xf32>
    %281 = vector.extract_strided_slice %213 {offsets = [0, 88], sizes = [16, 8], strides = [1, 1]} : vector<16x96xf32> to vector<16x8xf32>
    %cst_120 = arith.constant dense<0.000000e+00> : vector<16x16xf32>
    %282 = tpu.matmul %279, %280, %cst_120 {dimension_numbers = #tpu.dot_dimension_numbers<[1], [1], [0], [0], [0, 0, 1, 0], [], []>} : vector<16x8xf32>, vector<16x8xf32>, vector<16x16xf32> -> vector<16x16xf32>
    %cst_121 = arith.constant 0.353553385 : f32
    %283 = vector.broadcast %cst_121 : f32 to vector<16x16xf32>
    %284 = arith.mulf %282, %283 : vector<16x16xf32>
    %285 = arith.addf %284, %1 : vector<16x16xf32>
    %cst_122 = arith.constant dense<0xFF800000> : vector<16xf32>
    %286 = vector.multi_reduction <maximumf>, %285, %cst_122 [1] : vector<16x16xf32> to vector<16xf32>
    %287 = vector.shape_cast %286 : vector<16xf32> to vector<16x1xf32>
    %288 = vector.broadcast %287 : vector<16x1xf32> to vector<16x16xf32>
    %289 = arith.subf %285, %288 : vector<16x16xf32>
    %290 = math.exp %289 : vector<16x16xf32>
    %cst_123 = arith.constant dense<0.000000e+00> : vector<16xf32>
    %291 = vector.multi_reduction <add>, %290, %cst_123 [1] : vector<16x16xf32> to vector<16xf32>
    %292 = vector.shape_cast %291 : vector<16xf32> to vector<16x1xf32>
    %293 = vector.broadcast %292 : vector<16x1xf32> to vector<16x16xf32>
    %294 = arith.divf %290, %293 : vector<16x16xf32>
    %cst_124 = arith.constant dense<0.000000e+00> : vector<16x8xf32>
    %295 = tpu.matmul %294, %281, %cst_124 {dimension_numbers = #tpu.dot_dimension_numbers<[1], [0], [0], [1], [0, 0, 1, 1], [], []>} : vector<16x16xf32>, vector<16x8xf32>, vector<16x8xf32> -> vector<16x8xf32>
    %296 = vector.extract_strided_slice %215 {offsets = [24, 0], sizes = [8, 32], strides = [1, 1]} : vector<32x32xf32> to vector<8x32xf32>
    %cst_125 = arith.constant dense<0.000000e+00> : vector<16x32xf32>
    %297 = tpu.matmul %295, %296, %cst_125 {dimension_numbers = #tpu.dot_dimension_numbers<[1], [0], [0], [1], [0, 0, 1, 1], [], []>} : vector<16x8xf32>, vector<8x32xf32>, vector<16x32xf32> -> vector<16x32xf32>
    %298 = arith.addf %278, %297 : vector<16x32xf32>
    %299 = arith.addf %298, %206 : vector<16x32xf32>
    %c1_126 = arith.constant 1 : index
    %c0_127 = arith.constant 0 : index
    %c0_128 = arith.constant 0 : index
    %300 = vector.load %arg9[%c1_126, %c0_127, %c0_128] : memref<2x1x32xf32, #tpu.memory_space<vmem>>, vector<1x1x32xf32>
    %301 = vector.shape_cast %300 : vector<1x1x32xf32> to vector<1x32xf32>
    %c1_129 = arith.constant 1 : index
    %c0_130 = arith.constant 0 : index
    %c0_131 = arith.constant 0 : index
    %302 = vector.load %arg10[%c1_129, %c0_130, %c0_131] : memref<2x1x32xf32, #tpu.memory_space<vmem>>, vector<1x1x32xf32>
    %303 = vector.shape_cast %302 : vector<1x1x32xf32> to vector<1x32xf32>
    %cst_132 = arith.constant dense<0.000000e+00> : vector<16xf32>
    %304 = vector.multi_reduction <add>, %299, %cst_132 [1] : vector<16x32xf32> to vector<16xf32>
    %305 = vector.shape_cast %304 : vector<16xf32> to vector<16x1xf32>
    %cst_133 = arith.constant 3.200000e+01 : f32
    %306 = vector.broadcast %cst_133 : f32 to vector<16x1xf32>
    %307 = arith.divf %305, %306 : vector<16x1xf32>
    %308 = vector.broadcast %307 : vector<16x1xf32> to vector<16x32xf32>
    %309 = arith.subf %299, %308 : vector<16x32xf32>
    %310 = vector.broadcast %307 : vector<16x1xf32> to vector<16x32xf32>
    %311 = arith.subf %299, %310 : vector<16x32xf32>
    %312 = arith.mulf %309, %311 : vector<16x32xf32>
    %cst_134 = arith.constant dense<0.000000e+00> : vector<16xf32>
    %313 = vector.multi_reduction <add>, %312, %cst_134 [1] : vector<16x32xf32> to vector<16xf32>
    %314 = vector.shape_cast %313 : vector<16xf32> to vector<16x1xf32>
    %cst_135 = arith.constant 3.200000e+01 : f32
    %315 = vector.broadcast %cst_135 : f32 to vector<16x1xf32>
    %316 = arith.divf %314, %315 : vector<16x1xf32>
    %317 = vector.broadcast %307 : vector<16x1xf32> to vector<16x32xf32>
    %318 = arith.subf %299, %317 : vector<16x32xf32>
    %cst_136 = arith.constant 9.99999974E-6 : f32
    %319 = vector.broadcast %cst_136 : f32 to vector<16x1xf32>
    %320 = arith.addf %316, %319 : vector<16x1xf32>
    %321 = math.rsqrt %320 : vector<16x1xf32>
    %322 = vector.broadcast %321 : vector<16x1xf32> to vector<16x32xf32>
    %323 = arith.mulf %318, %322 : vector<16x32xf32>
    %324 = vector.broadcast %301 : vector<1x32xf32> to vector<16x32xf32>
    %325 = arith.mulf %323, %324 : vector<16x32xf32>
    %326 = vector.broadcast %303 : vector<1x32xf32> to vector<16x32xf32>
    %327 = arith.addf %325, %326 : vector<16x32xf32>
    %c1_137 = arith.constant 1 : index
    %c0_138 = arith.constant 0 : index
    %c0_139 = arith.constant 0 : index
    %328 = vector.load %arg11[%c1_137, %c0_138, %c0_139] : memref<2x32x64xf32, #tpu.memory_space<vmem>>, vector<1x32x64xf32>
    %329 = vector.shape_cast %328 : vector<1x32x64xf32> to vector<32x64xf32>
    %cst_140 = arith.constant dense<0.000000e+00> : vector<16x64xf32>
    %330 = tpu.matmul %327, %329, %cst_140 {dimension_numbers = #tpu.dot_dimension_numbers<[1], [0], [0], [1], [0, 0, 1, 1], [], []>} : vector<16x32xf32>, vector<32x64xf32>, vector<16x64xf32> -> vector<16x64xf32>
    %c1_141 = arith.constant 1 : index
    %c0_142 = arith.constant 0 : index
    %c0_143 = arith.constant 0 : index
    %331 = vector.load %arg12[%c1_141, %c0_142, %c0_143] : memref<2x1x64xf32, #tpu.memory_space<vmem>>, vector<1x1x64xf32>
    %332 = vector.shape_cast %331 : vector<1x1x64xf32> to vector<1x64xf32>
    %333 = vector.broadcast %332 : vector<1x64xf32> to vector<16x64xf32>
    %334 = arith.addf %330, %333 : vector<16x64xf32>
    %cst_144 = arith.constant 5.000000e-01 : f32
    %335 = vector.broadcast %cst_144 : f32 to vector<16x64xf32>
    %336 = arith.mulf %335, %334 : vector<16x64xf32>
    %cst_145 = arith.constant 4.471500e-02 : f32
    %337 = vector.broadcast %cst_145 : f32 to vector<16x64xf32>
    %338 = arith.mulf %337, %334 : vector<16x64xf32>
    %339 = arith.mulf %338, %334 : vector<16x64xf32>
    %340 = arith.mulf %339, %334 : vector<16x64xf32>
    %341 = arith.addf %334, %340 : vector<16x64xf32>
    %cst_146 = arith.constant 0.797884583 : f32
    %342 = vector.broadcast %cst_146 : f32 to vector<16x64xf32>
    %343 = arith.mulf %342, %341 : vector<16x64xf32>
    %344 = math.tanh %343 : vector<16x64xf32>
    %cst_147 = arith.constant 1.000000e+00 : f32
    %345 = vector.broadcast %cst_147 : f32 to vector<16x64xf32>
    %346 = arith.addf %345, %344 : vector<16x64xf32>
    %347 = arith.mulf %336, %346 : vector<16x64xf32>
    %c1_148 = arith.constant 1 : index
    %c0_149 = arith.constant 0 : index
    %c0_150 = arith.constant 0 : index
    %348 = vector.load %arg13[%c1_148, %c0_149, %c0_150] : memref<2x64x32xf32, #tpu.memory_space<vmem>>, vector<1x64x32xf32>
    %349 = vector.shape_cast %348 : vector<1x64x32xf32> to vector<64x32xf32>
    %cst_151 = arith.constant dense<0.000000e+00> : vector<16x32xf32>
    %350 = tpu.matmul %347, %349, %cst_151 {dimension_numbers = #tpu.dot_dimension_numbers<[1], [0], [0], [1], [0, 0, 1, 1], [], []>} : vector<16x64xf32>, vector<64x32xf32>, vector<16x32xf32> -> vector<16x32xf32>
    %c1_152 = arith.constant 1 : index
    %c0_153 = arith.constant 0 : index
    %c0_154 = arith.constant 0 : index
    %351 = vector.load %arg14[%c1_152, %c0_153, %c0_154] : memref<2x1x32xf32, #tpu.memory_space<vmem>>, vector<1x1x32xf32>
    %352 = vector.shape_cast %351 : vector<1x1x32xf32> to vector<1x32xf32>
    %353 = vector.broadcast %352 : vector<1x32xf32> to vector<16x32xf32>
    %354 = arith.addf %350, %353 : vector<16x32xf32>
    %355 = arith.addf %354, %327 : vector<16x32xf32>
    %c1_155 = arith.constant 1 : index
    %c0_156 = arith.constant 0 : index
    %c0_157 = arith.constant 0 : index
    %356 = vector.load %arg15[%c1_155, %c0_156, %c0_157] : memref<2x1x32xf32, #tpu.memory_space<vmem>>, vector<1x1x32xf32>
    %357 = vector.shape_cast %356 : vector<1x1x32xf32> to vector<1x32xf32>
    %c1_158 = arith.constant 1 : index
    %c0_159 = arith.constant 0 : index
    %c0_160 = arith.constant 0 : index
    %358 = vector.load %arg16[%c1_158, %c0_159, %c0_160] : memref<2x1x32xf32, #tpu.memory_space<vmem>>, vector<1x1x32xf32>
    %359 = vector.shape_cast %358 : vector<1x1x32xf32> to vector<1x32xf32>
    %cst_161 = arith.constant dense<0.000000e+00> : vector<16xf32>
    %360 = vector.multi_reduction <add>, %355, %cst_161 [1] : vector<16x32xf32> to vector<16xf32>
    %361 = vector.shape_cast %360 : vector<16xf32> to vector<16x1xf32>
    %cst_162 = arith.constant 3.200000e+01 : f32
    %362 = vector.broadcast %cst_162 : f32 to vector<16x1xf32>
    %363 = arith.divf %361, %362 : vector<16x1xf32>
    %364 = vector.broadcast %363 : vector<16x1xf32> to vector<16x32xf32>
    %365 = arith.subf %355, %364 : vector<16x32xf32>
    %366 = vector.broadcast %363 : vector<16x1xf32> to vector<16x32xf32>
    %367 = arith.subf %355, %366 : vector<16x32xf32>
    %368 = arith.mulf %365, %367 : vector<16x32xf32>
    %cst_163 = arith.constant dense<0.000000e+00> : vector<16xf32>
    %369 = vector.multi_reduction <add>, %368, %cst_163 [1] : vector<16x32xf32> to vector<16xf32>
    %370 = vector.shape_cast %369 : vector<16xf32> to vector<16x1xf32>
    %cst_164 = arith.constant 3.200000e+01 : f32
    %371 = vector.broadcast %cst_164 : f32 to vector<16x1xf32>
    %372 = arith.divf %370, %371 : vector<16x1xf32>
    %373 = vector.broadcast %363 : vector<16x1xf32> to vector<16x32xf32>
    %374 = arith.subf %355, %373 : vector<16x32xf32>
    %cst_165 = arith.constant 9.99999974E-6 : f32
    %375 = vector.broadcast %cst_165 : f32 to vector<16x1xf32>
    %376 = arith.addf %372, %375 : vector<16x1xf32>
    %377 = math.rsqrt %376 : vector<16x1xf32>
    %378 = vector.broadcast %377 : vector<16x1xf32> to vector<16x32xf32>
    %379 = arith.mulf %374, %378 : vector<16x32xf32>
    %380 = vector.broadcast %357 : vector<1x32xf32> to vector<16x32xf32>
    %381 = arith.mulf %379, %380 : vector<16x32xf32>
    %382 = vector.broadcast %359 : vector<1x32xf32> to vector<16x32xf32>
    %383 = arith.addf %381, %382 : vector<16x32xf32>
    %c0_166 = arith.constant 0 : index
    %c0_167 = arith.constant 0 : index
    %c0_168 = arith.constant 0 : index
    %384 = vector.load %arg17[%c0_166, %c0_167, %c0_168] : memref<1x16x32xf32, #tpu.memory_space<vmem>>, vector<1x16x32xf32>
    %385 = vector.shape_cast %384 : vector<1x16x32xf32> to vector<16x32xf32>
    %386 = vector.shape_cast %383 : vector<16x32xf32> to vector<1x16x32xf32>
    tpu.vector_store %arg17[%c0_166, %c0_167, %c0_168], %386 {strides = array<i32>} : memref<1x16x32xf32, #tpu.memory_space<vmem>>, vector<1x16x32xf32>,
    return
  }
  func.func @transform_0(%arg0: i32) -> (i32, i32, i32) {
    %c0_i32 = arith.constant 0 : i32
    %c0_i32_0 = arith.constant 0 : i32
    %c0_i32_1 = arith.constant 0 : i32
    return %arg0, %c0_i32, %c0_i32_0 : i32, i32, i32
  }
  func.func @transform_1(%arg0: i32) -> (i32, i32, i32) {
    %c0_i32 = arith.constant 0 : i32
    %c0_i32_0 = arith.constant 0 : i32
    %c0_i32_1 = arith.constant 0 : i32
    return %arg0, %c0_i32, %c0_i32_0 : i32, i32, i32
  }
  func.func @transform_2(%arg0: i32) -> (i32, i32) {
    %c0_i32 = arith.constant 0 : i32
    %c0_i32_0 = arith.constant 0 : i32
    %c0_i32_1 = arith.constant 0 : i32
    return %c0_i32, %c0_i32_0 : i32, i32
  }
  func.func @transform_3(%arg0: i32) -> (i32, i32) {
    %c0_i32 = arith.constant 0 : i32
    %c0_i32_0 = arith.constant 0 : i32
    %c0_i32_1 = arith.constant 0 : i32
    return %c0_i32, %c0_i32_0 : i32, i32
  }
  func.func @transform_4(%arg0: i32) -> (i32, i32, i32) {
    %c0_i32 = arith.constant 0 : i32
    %c0_i32_0 = arith.constant 0 : i32
    %c0_i32_1 = arith.constant 0 : i32
    %c0_i32_2 = arith.constant 0 : i32
    return %c0_i32, %c0_i32_0, %c0_i32_1 : i32, i32, i32
  }
  func.func @transform_5(%arg0: i32) -> (i32, i32, i32) {
    %c0_i32 = arith.constant 0 : i32
    %c0_i32_0 = arith.constant 0 : i32
    %c0_i32_1 = arith.constant 0 : i32
    %c0_i32_2 = arith.constant 0 : i32
    return %c0_i32, %c0_i32_0, %c0_i32_1 : i32, i32, i32
  }
  func.func @transform_6(%arg0: i32) -> (i32, i32, i32) {
    %c0_i32 = arith.constant 0 : i32
    %c0_i32_0 = arith.constant 0 : i32
    %c0_i32_1 = arith.constant 0 : i32
    %c0_i32_2 = arith.constant 0 : i32
    return %c0_i32, %c0_i32_0, %c0_i32_1 : i32, i32, i32
  }
  func.func @transform_7(%arg0: i32) -> (i32, i32, i32) {
    %c0_i32 = arith.constant 0 : i32
    %c0_i32_0 = arith.constant 0 : i32
    %c0_i32_1 = arith.constant 0 : i32
    %c0_i32_2 = arith.constant 0 : i32
    return %c0_i32, %c0_i32_0, %c0_i32_1 : i32, i32, i32
  }
  func.func @transform_8(%arg0: i32) -> (i32, i32, i32) {
    %c0_i32 = arith.constant 0 : i32
    %c0_i32_0 = arith.constant 0 : i32
    %c0_i32_1 = arith.constant 0 : i32
    %c0_i32_2 = arith.constant 0 : i32
    return %c0_i32, %c0_i32_0, %c0_i32_1 : i32, i32, i32
  }
  func.func @transform_9(%arg0: i32) -> (i32, i32, i32) {
    %c0_i32 = arith.constant 0 : i32
    %c0_i32_0 = arith.constant 0 : i32
    %c0_i32_1 = arith.constant 0 : i32
    %c0_i32_2 = arith.constant 0 : i32
    return %c0_i32, %c0_i32_0, %c0_i32_1 : i32, i32, i32
  }
  func.func @transform_10(%arg0: i32) -> (i32, i32, i32) {
    %c0_i32 = arith.constant 0 : i32
    %c0_i32_0 = arith.constant 0 : i32
    %c0_i32_1 = arith.constant 0 : i32
    %c0_i32_2 = arith.constant 0 : i32
    return %c0_i32, %c0_i32_0, %c0_i32_1 : i32, i32, i32
  }
  func.func @transform_11(%arg0: i32) -> (i32, i32, i32) {
    %c0_i32 = arith.constant 0 : i32
    %c0_i32_0 = arith.constant 0 : i32
    %c0_i32_1 = arith.constant 0 : i32
    %c0_i32_2 = arith.constant 0 : i32
    return %c0_i32, %c0_i32_0, %c0_i32_1 : i32, i32, i32
  }
  func.func @transform_12(%arg0: i32) -> (i32, i32, i32) {
    %c0_i32 = arith.constant 0 : i32
    %c0_i32_0 = arith.constant 0 : i32
    %c0_i32_1 = arith.constant 0 : i32
    %c0_i32_2 = arith.constant 0 : i32
    return %c0_i32, %c0_i32_0, %c0_i32_1 : i32, i32, i32
  }
  func.func @transform_13(%arg0: i32) -> (i32, i32, i32) {
    %c0_i32 = arith.constant 0 : i32
    %c0_i32_0 = arith.constant 0 : i32
    %c0_i32_1 = arith.constant 0 : i32
    %c0_i32_2 = arith.constant 0 : i32
    return %c0_i32, %c0_i32_0, %c0_i32_1 : i32, i32, i32
  }
  func.func @transform_14(%arg0: i32) -> (i32, i32, i32) {
    %c0_i32 = arith.constant 0 : i32
    %c0_i32_0 = arith.constant 0 : i32
    %c0_i32_1 = arith.constant 0 : i32
    %c0_i32_2 = arith.constant 0 : i32
    return %c0_i32, %c0_i32_0, %c0_i32_1 : i32, i32, i32
  }
  func.func @transform_15(%arg0: i32) -> (i32, i32, i32) {
    %c0_i32 = arith.constant 0 : i32
    %c0_i32_0 = arith.constant 0 : i32
    %c0_i32_1 = arith.constant 0 : i32
    %c0_i32_2 = arith.constant 0 : i32
    return %c0_i32, %c0_i32_0, %c0_i32_1 : i32, i32, i32
  }
  func.func @transform_16(%arg0: i32) -> (i32, i32, i32) {
    %c0_i32 = arith.constant 0 : i32
    %c0_i32_0 = arith.constant 0 : i32
    %c0_i32_1 = arith.constant 0 : i32
    return %arg0, %c0_i32, %c0_i32_0 : i32, i32, i32
  }
}

</mosaic_0001>

<bundles_post_ra>
// kernel: tpu_custom_call.1
= control target key start
LH: loop header
LB: loop body
LE: loop exit
PB: predicated region body
PF: predicated region fallthrough
CT: control target
= control target key end

     0   :  { %s5609_s0 = inlined_call_operand.hbm [shape: f32[2,16,32], index: 0, kind: input, shape index: {}]   ;;  %s5610_s1 = inlined_call_operand.hbm [shape: f32[2,16,16], index: 1, kind: input, shape index: {}]   ;;  %s5611_s2 = inlined_call_operand.hbm [shape: f32[1,32], index: 2, kind: input, shape index: {}]   ;;  %s5612_s3 = inlined_call_operand.hbm [shape: f32[1,32], index: 3, kind: input, shape index: {}]   ;;  %s5613_s4 = inlined_call_operand.vmem [shape: f32[2,32,96], index: 4, kind: input, shape index: {}]   ;;  %s5614_s5 = inlined_call_operand.vmem [shape: f32[2,1,96], index: 5, kind: input, shape index: {}]   ;;  %s5615_s6 = inlined_call_operand.vmem [shape: f32[2,32,32], index: 6, kind: input, shape index: {}]   ;;  %s5616_s7 = inlined_call_operand.vmem [shape: f32[2,1,32], index: 7, kind: input, shape index: {}]   ;;  %s5617_s8 = inlined_call_operand.vmem [shape: f32[2,1,32], index: 8, kind: input, shape index: {}]   ;;  %s5618_s9 = inlined_call_operand.vmem [shape: f32[2,1,32], index: 9, kind: input, shape index: {}]   ;;  %s5619_s10 = inlined_call_operand.vmem [shape: f32[2,32,64], index: 10, kind: input, shape index: {}]   ;;  %s5620_s11 = inlined_call_operand.vmem [shape: f32[2,1,64], index: 11, kind: input, shape index: {}]   ;;  %s5621_s12 = inlined_call_operand.vmem [shape: f32[2,64,32], index: 12, kind: input, shape index: {}]   ;;  %s5622_s13 = inlined_call_operand.vmem [shape: f32[2,1,32], index: 13, kind: input, shape index: {}]   ;;  %s5623_s14 = inlined_call_operand.vmem [shape: f32[2,1,32], index: 14, kind: input, shape index: {}]   ;;  %s5624_s15 = inlined_call_operand.vmem [shape: f32[2,1,32], index: 15, kind: input, shape index: {}]   ;;  %s5625_s16 = inlined_call_operand.hbm [shape: f32[2,16,32], index: 16, kind: output, shape index: {}]  }
   0x1   :  { %5653 = sst [smem:[#allocation22_spill]] %s5609_s0 }
   0x2   :  { %5654 = sst [smem:[#allocation23_spill]] %s5611_s2 }
   0x3   :  { %5655 = sst [smem:[#allocation24_spill]] %s5612_s3 }
   0x4   :  { %5656 = sst [smem:[#allocation25_spill]] %s5622_s13 }
   0x5   :  { %5657 = sst [smem:[#allocation26_spill]] %s5623_s14 }
   0x6   :  { %5658 = sst [smem:[#allocation27_spill]] %s5624_s15 }
   0x7   :  { %5659 = sst [smem:[#allocation28_spill]] %s5625_s16 }
   0x8   :  { %21 = vsyncpa [#allocation3], 0 }
   0x9   :  { %23 = vsyncpa [#allocation3 + $0x1], 0 }
   0xa   :  { %24 = vsyncpa [#allocation6], 0 }
   0xb   :  { %26 = vsyncpa [#allocation6 + $0x1], 0 }
   0xc   :  { %27 = vsyncpa [#allocation9], 0 }
   0xd   :  { %28 = vsyncpa [#allocation4], 0 }
   0xe   :  { %30 = vsyncpa [#allocation4 + $0x1], 0  ;;  %s4880_s21 = smov 0   ;;  %s4882_s22 = smov 0  }
   0xf   :  { %s4884_s23 = smov 0   ;;  %s4886_s24 = smov 0  }
  0x10 LB: > { %5660 = sst [smem:[#allocation16_spill]] %s4761_s21  ;;  %s4901_s25 = sadd.s32 4294967295, %s4773_s24   ;;  %s4773_s24 = sphi %s4886_s24, %s5698_s24   ;;  %s4769_s23 = sphi %s4884_s23, %s5700_s23   ;;  %s4765_s22 = sphi %s4882_s22, %s5702_s22   ;;  %s4761_s21 = sphi %s4880_s21, %s5701_s21  }
  0x11   : > { %5661 = sst [smem:[#allocation17_spill]] %s4769_s23  ;;  %s3895_s26 = sadd.s32 4294967294, %s4773_s24  }
  0x12   : > { %s4905_s27 = sadd.s32 1, %s4773_s24   ;;  %s43_s28 = sadd.s32 1, %s4769_s23 }
  0x13   : > { %5662 = sst [smem:[#allocation18_spill]] %s4905_s27  ;;  %s40_s29 = ssub.s32 %s4773_s24, %s4905_s27 }
  0x14   : > { %p50_p0 = scmp.ne.s32.totalorder %s4769_s23, %s4765_s22  ;;  %p41_p1 = scmp.eq.s32.totalorder %s40_s29, 0 }
  0x15   : > { %p51_p2 = scmp.eq.s32.totalorder %s4773_s24, 0  ;;  %p56_p3 = scmp.ne.s32.totalorder %s4765_s22, %s4761_s21 }
  0x16   : > { %p5627_p4 = scmp.eq.s32.totalorder %s4901_s25, 0  ;;  %p400_p7 = scmp.eq.s32.totalorder %s4901_s25, 1 }
  0x17   : > { %s4917_s30 = scalar_select %p41_p1, %s4769_s23, %s43_s28  }
  0x18   : > { %p4919_p5 = por %p51_p2, %p50_p0  ;;  %p4925_p6 = por %p5627_p4, %p56_p3 }
  0x19   : > { %5663 = sst [smem:[#allocation19_spill]] %s4917_s30  ;;  %p406_p8 = scmp.eq.s32.totalorder %s3895_s26, 1 }
  0x1a   : > { %s5665_s17 = scalar_select %p4925_p6, 1, 0 }
  0x1b   : > { %p3896_p9 = scmp.ge.s32.totalorder %s4773_s24, 1  ;;  %p413_p10 = scmp.lt.s32.totalorder %s4773_s24, 3 }
  0x1c   : > { %p4932_p11 = por %p400_p7, %p50_p0  ;;  %p4936_p12 = por %p406_p8, %p56_p3 }
  0x1d   : > { %p4940_p13 = pnand %p3896_p9, %p413_p10  ;;  %s4775_s28 = smov [#allocation7]  }
  0x1e   : > { %s5666_s18 = scalar_select %p4932_p11, 1, 0 }
  0x1f   : > { %s5668_s19 = scalar_select %p4936_p12, 1, 0 }
  0x20   : > { %5667 = sst [smem:[#allocation20_spill]] %s5666_s18  ;;  %p4422_p2 = pneg %p4940_p13 }
  0x21   : > { %5669 = sst [smem:[#allocation21_spill]] %s5668_s19  ;;  %s426_s26 = sshll.u32 %s4775_s28, 4  ;;  %s427_s26 = int_to_ptr.vmem [resolvable:$true] %s426_s26 }
  0x22   : > { %p4442_p4 = scmp.lt.s32.totalorder %s4773_s24, 2  ;;  %p5671_p0 = scmp.eq.s32.totalorder %s4901_s25, 0 }
  0x23   : > { %s4776_s27 = smov [#allocation8]   ;;  %s4600_s28 = scalar_lea.vmem %s427_s26, 16 }
  0x24   : > { %p4950_p7 = pnand %p4422_p2, %p5671_p0  ;;  %p4956_p3 = pnand %p4442_p4, %p4919_p5 }
  0x25   : > { %s437_s19 = sshll.u32 %s4776_s27, 4  ;;  %p4601_p9 = scmp.ne.s32.totalorder %s427_s26, %s4600_s28  ;;  %s438_s19 = int_to_ptr.vmem [resolvable:$true] %s437_s19 }
  0x26   : > { %p4591_p8 = pneg %p4950_p7  ;;  %s4607_s21 = scalar_lea.vmem %s427_s26, 32 }
  0x27   : > { %p4608_p0 = scmp.lt.s32.totalorder %s427_s26, %s427_s26  ;;  %p4609_p1 = scmp.lt.s32.totalorder %s4607_s21, %s4600_s28 }
  0x28   : > { %p4603_p10 = pnand %p4601_p9, %p4591_p8 }
  0x29   : > { %p4610_p12 = por %p4609_p1, %p4608_p0 }
  0x2a   : > { %p4604_p2 = pneg %p4603_p10 }
  0x2c   : > { %p4611_p11 = pnand %p4610_p12, %p4604_p2 }
  0x2e   : > { %4614 = shalt.err (!%p4611_p11)
}
  0x2f   : > { %s5674_s2 = sld [smem:[#allocation23_spill]]  ;;  %s484_s27 = sand.u32 1, %s4769_s23  }
  0x30   : > { %s4626_s18 = scalar_lea.vmem %s438_s19, 16  ;;  %s4633_s15 = scalar_lea.vmem %s438_s19, 32 }
  0x31   : > { %p4627_p4 = scmp.ne.s32.totalorder %s438_s19, %s4626_s18  ;;  %p4634_p10 = scmp.lt.s32.totalorder %s438_s19, %s438_s19 }
  0x32   : > { %p4635_p1 = scmp.lt.s32.totalorder %s4633_s15, %s4626_s18 }
  0x33   : > { %p4629_p5 = pnand %p4627_p4, %p4591_p8 }
  0x34   : > { %p4636_p12 = por %p4635_p1, %p4634_p10 }
  0x35   : > { %4425 = dma.hbm_to_vmem [thread:$0]  (!%p4950_p7), %s5674_s2, 16, %s427_s26, [#allocation6]  }
  0x36   : > { %p4630_p9 = pneg %p4629_p5 }
  0x38   : > { %p4637_p11 = pnand %p4636_p12, %p4630_p9 }
  0x3a   : > { %4640 = shalt.err (!%p4637_p11)
}
  0x3b   : > { %s5675_s3 = sld [smem:[#allocation24_spill]]  ;;  %s4979_s26 = sshll.u32 %s484_s27, 4 }
  0x3c   : > { %s5637_s28 = sshll.u32 %s4773_s24, 8  ;;  %s5676_s18 = sld [smem:[#allocation22_spill]] }
  0x3d   : > { %s488_s29 = scalar_lea.vmem [#allocation2], %s4979_s26  ;;  %s4992_s16 = scalar_lea.sflag [#allocation3], %s484_s27 }
  0x3e   : > { %s495_s21 = sshll.u32 %s488_s29, 4  ;;  %p4643_p8 = pneg %p4956_p3  ;;  %s4990_s21 = int_to_ptr.vmem [resolvable:$true] %s495_s21 }
  0x41   : > { %4428 = dma.hbm_to_vmem [thread:$0]  (!%p4950_p7), %s5675_s3, 16, %s438_s19, [#allocation9]  }
  0x42   : > { %s4987_s2 = scalar_lea.hbm %s5676_s18, %s5637_s28  ;;  %s4646_s28 = scalar_lea.hbm %s5676_s18, 512 }
  0x43   : > { %s4641_s19 = scalar_lea.hbm %s4987_s2, 256  ;;  %p4647_p4 = scmp.lt.s32.totalorder %s4987_s2, %s5676_s18 }
  0x44   : > { %p4642_p7 = scmp.ne.s32.totalorder %s4987_s2, %s4641_s19  ;;  %p4648_p5 = scmp.lt.s32.totalorder %s4646_s28, %s4641_s19 }
  0x46   : > { %p4644_p2 = pnand %p4643_p8, %p4642_p7  ;;  %p4649_p9 = por %p4648_p5, %p4647_p4 }
  0x48   : > { %p4645_p0 = pneg %p4644_p2 }
  0x4a   : > { %p4650_p10 = pnand %p4649_p9, %p4645_p0 }
  0x4c   : > { %4653 = shalt.err (!%p4650_p10)
}
  0x4d   : > { %s4654_s27 = scalar_lea.vmem %s4990_s21, 256  ;;  %s4777_s29 = smov [#allocation2]  }
  0x4e   : > { %p4655_p1 = scmp.ne.s32.totalorder %s4990_s21, %s4654_s27  ;;  %s4659_s0 = sshll.u32 %s4777_s29, 4  ;;  %s4660_s0 = int_to_ptr.vmem [resolvable:$false] %s4659_s0 }
  0x4f   : > { %s4661_s15 = scalar_lea.vmem %s4660_s0, 512  ;;  %p4662_p7 = scmp.lt.s32.totalorder %s4990_s21, %s4660_s0 }
  0x50   : > { %p4657_p12 = pnand %p4655_p1, %p4643_p8  ;;  %p4663_p2 = scmp.lt.s32.totalorder %s4661_s15, %s4654_s27 }
  0x52   : > { %p4658_p11 = pneg %p4657_p12  ;;  %p4664_p6 = por %p4663_p2, %p4662_p7 }
  0x54   : > { %p4665_p4 = pnand %p4664_p6, %p4658_p11 }
  0x56   : > { %4668 = shalt.err (!%p4665_p4)
}
  0x57   : > { %s4778_s3 = smov 128   ;;  %s4779_s23 = smov 8  }
  0x58   : > { %4432 = dma.hbm_to_vmem [thread:$0]  (!%p4956_p3), %s4987_s2, 256, %s4990_s21, %s4992_s16, %s4778_s3, %s4778_s3, %s4779_s23  }
  0x59   : > { %s5677_s28 = sshll.u32 %s4773_s24, 8  ;;  %s509_s0 = scalar_lea.vmem [#allocation5], %s4979_s26 }
  0x5a   : > { %s5027_s29 = scalar_lea.hbm %s5610_s1, %s5677_s28  ;;  %s516_s15 = sshll.u32 %s509_s0, 4  ;;  %s5030_s15 = int_to_ptr.vmem [resolvable:$true] %s516_s15 }
  0x5b   : > { %s505_s18 = sand.u32 1, %s4773_s24   ;;  %s4669_s13 = scalar_lea.hbm %s5027_s29, 256 }
  0x5c   : > { %s506_s14 = scalar_lea.sflag [#allocation6], %s505_s18  ;;  %p4670_p6 = scmp.ne.s32.totalorder %s5027_s29, %s4669_s13 }
  0x5d   : > { %s4674_s16 = scalar_lea.hbm %s5610_s1, 512  ;;  %p4675_p9 = scmp.lt.s32.totalorder %s5027_s29, %s5610_s1 }
  0x5e   : > { %p4672_p0 = pnand %p4670_p6, %p4643_p8  ;;  %p4676_p10 = scmp.lt.s32.totalorder %s4674_s16, %s4669_s13 }
  0x60   : > { %p4673_p5 = pneg %p4672_p0  ;;  %p4677_p1 = por %p4676_p10, %p4675_p9 }
  0x62   : > { %p4678_p12 = pnand %p4677_p1, %p4673_p5 }
  0x64   : > { %4681 = shalt.err (!%p4678_p12)
}
  0x65   : > { %s4682_s26 = scalar_lea.vmem %s5030_s15, 256  ;;  %s4780_s18 = smov [#allocation5]  }
  0x66   : > { %p4683_p11 = scmp.ne.s32.totalorder %s5030_s15, %s4682_s26  ;;  %s4687_s27 = sshll.u32 %s4780_s18, 4  ;;  %s4688_s27 = int_to_ptr.vmem [resolvable:$false] %s4687_s27 }
  0x67   : > { %s4689_s0 = scalar_lea.vmem %s4688_s27, 512  ;;  %p4690_p4 = scmp.lt.s32.totalorder %s5030_s15, %s4688_s27 }
  0x68   : > { %p4685_p7 = pnand %p4683_p11, %p4643_p8  ;;  %p4691_p6 = scmp.lt.s32.totalorder %s4689_s0, %s4682_s26 }
  0x6a   : > { %p4686_p2 = pneg %p4685_p7  ;;  %p4692_p0 = por %p4691_p6, %p4690_p4 }
  0x6c   : > { %p4693_p9 = pnand %p4692_p0, %p4686_p2 }
  0x6e   : > { %4696 = shalt.err (!%p4693_p9)
}
  0x6f   : > { %4435 = dma.hbm_to_vmem [thread:$0]  (!%p4956_p3), %s5027_s29, 256, %s5030_s15, %s506_s14, %s4778_s3, %s4778_s3, %s4779_s23  }
  0x70   : > { %528 = sbr.rel (%p4940_p13) target bundleno = 6932 (0x1b14), region = 84  ;;  %s5061_s13 = sand.u32 (!%p4940_p13), 1, %s4765_s22  }
  0x71   : > { %s5064_s2 = sshll.u32 (!%p4940_p13), %s5061_s13, 4  ;;  %s531_s21 = scalar_lea.sflag (!%p4940_p13), [#allocation3], %s5061_s13 }
  0x72   : > { %s534_s30 = scalar_lea.vmem (!%p4940_p13), [#allocation2], %s5064_s2  ;;  %p5678_p8 = scmp.ne.s32.totalorder (!%p4940_p13), %s5665_s17, 0 }
  0x75   : > { %4740 = dma.done.wait (%p5678_p8), %s531_s21, 256  }
  0x76   : > { %4742 = vsyncadd (%p5678_p8), %s531_s21, 4294967040  ;;  %s539_s14 = sand.u32 1, %s4901_s25   ;;  %s5074_s3 = scalar_lea.vmem [#allocation5], %s5064_s2 }
  0x77   : > { %s540_s20 = scalar_lea.sflag [#allocation6], %s539_s14 }
  0x78   : > { %4744 = dma.done.wait (%p5678_p8), %s540_s20, 256  }
  0x79   : > { %4746 = vsyncadd (%p5678_p8), %s540_s20, 4294967040  ;;  %p5679_p13 = scmp.eq.s32.totalorder %s4901_s25, 0 }
  0x7b   : > { %4748 = dma.done.wait (%p5679_p13), [#allocation6], 16   ;;  %p5680_p3 = pmov %p5679_p13 }
  0x7d   : > { %4750 = vsyncadd (%p5680_p3), [#allocation6], 4294967280  ;;  %p5681_p5 = pmov %p5680_p3 }
  0x7e   : > { %p5682_p10 = pmov %p5680_p3 }
  0x7f   : > { %4752 = dma.done.wait (%p5681_p5), [#allocation9], 16  }
  0x80   : > { %4754 = vsyncadd (%p5682_p10), [#allocation9], 4294967280  ;;  %vm611_vm0 = vcmask 261120   ;;  %v607_v0 = vld [vmem:[%s534_s30] sm:$0xff]  ;;  %v608_v1 = vld [vmem:[%s534_s30 + $0x8] sm:$0xff]  ;;  %vm758_vm1 = vcmask 64512  }
  0x81   : > { %v612_v2 = vsel %vm611_vm0, %v607_v0, 0.0  ;;  %v615_v3 = vsel %vm611_vm0, %v608_v1, 0.0  ;;  %v658_v14 = vld [vmem:[%s5613_s4 + $0x18] sm:$0xff]  ;;  %v657_v15 = vld [vmem:[%s5613_s4 + $0x10] sm:$0xff]  ;;  %v656_v16 = vld [vmem:[%s5613_s4 + $0x8] sm:$0xff]  ;;  %s4781_s0 = smov 96  }
  0x82   : > { %613 = vadd.xlane.f32.xlu0 %v612_v2  ;;  %4174 = vmatprep.subr.mxu0 %v658_v14  ;;  %v655_v17 = vld [vmem:[%s5613_s4] sm:$0xff]  ;;  %v5132_v42 = vld [vmem:[%s5074_s3 + $0x8] sm:$0xff]  ;;  %vm846_vm2 = vcmask 130048   ;;  %s4782_s21 = smov 64   ;;  %s4783_s30 = smov 88   ;;  %vm2077_vm3 = vcmask 523264  }
  0x83   : > { %4175 = vmatpush3.msra.mxu0 %v658_v14  ;;  %v3912_v25 = vld [vmem:[#allocation7] ss:$0 sm:$0xff]  ;;  %v3913_v27 = vld [vmem:[#allocation8] ss:$0 sm:$0xff]  ;;  %s4784_s14 = smov 120   ;;  %s4785_s20 = smov 80  }
  0x84   : > { %4176 = vmatprep.subr.mxu0 %v657_v15  ;;  %v3914_v34 = vld [vmem:[%s5614_s5] ss:$0 sm:$0xff]  ;;  %s4786_s17 = smov 112   ;;  %s5651_s15 = smov 56  }
  0x85   : > { %4177 = vmatpush3.msra.mxu0 %v657_v15  ;;  %v5135_v45 = vld [vmem:[%s5074_s3] sm:$0xff]  ;;  %s5649_s16 = smov 72   ;;  %s5647_s28 = smov 104  }
  0x86   : > { %616 = vadd.xlane.f32.xlu0 %v615_v3  ;;  %4178 = vmatprep.subr.mxu0 %v656_v16  ;;  %s5645_s19 = smov 48   ;;  %s5643_s29 = smov 40  }
  0x87   : > { %4179 = vmatpush3.msra.mxu0 %v656_v16  ;;  %s5685_s18 = sld [smem:[#allocation27_spill]]  ;;  %s5690_s26 = smov 40  }
  0x88   : > { %4180 = vmatprep.subr.mxu0 %v655_v17  ;;  %s5691_s23 = sld [smem:[#allocation20_spill]] }
  0x89   : > { %4181 = vmatpush3.msra.mxu0 %v655_v17 }
  0x8e   : > { %p5693_p12 = scmp.ne.s32.totalorder %s5691_s23, 0 }
 0x10b   : > { %v614_v4 = vpop.xlane.xlu0 %613 }
 0x10c   : > { %v619_v5 = vmul.f32 0.03125, %v614_v4 }
 0x10e   : > { %v621_v6 = vsub.f32 %v607_v0, %v619_v5 }
 0x10f   : > { %v617_v7 = vpop.xlane.xlu0 %616 }
 0x110   : > { %v620_v8 = vmul.f32 0.03125, %v617_v7  ;;  %v623_v9 = vmul.f32 %v621_v6, %v621_v6 }
 0x112   : > { %v622_v10 = vsub.f32 %v608_v1, %v620_v8  ;;  %v625_v11 = vsel %vm611_vm0, %v623_v9, 0.0  ;;  %v747_v1 = vld [vmem:[%s5615_s6] sm:$0xff] }
 0x113   : > { %626 = vadd.xlane.f32.xlu1 %v625_v11 }
 0x114   : > { %v624_v12 = vmul.f32 %v622_v10, %v622_v10 }
 0x116   : > { %v628_v13 = vsel %vm611_vm0, %v624_v12, 0.0 }
 0x117   : > { %629 = vadd.xlane.f32.xlu1 %v628_v13 }
 0x19c   : > { %v627_v18 = vpop.xlane.xlu1 %626 }
 0x19d   : > { %v631_v19 = vmul.f32 0.03125, %v627_v18 }
 0x19f   : > { %v633_v20 = vadd.f32 1e-05, %v631_v19 }
 0x1a0   : > { %v630_v21 = vpop.xlane.xlu1 %629 }
 0x1a1   : > { %4495 = vrsqrt.f32 %v633_v20  ;;  %v632_v22 = vmul.f32 0.03125, %v630_v21 }
 0x1a3   : > { %v634_v23 = vadd.f32 1e-05, %v632_v22 }
 0x1a5   : > { %4497 = vrsqrt.f32 %v634_v23 }
 0x1ae   : > { %v4496_v24 = vpop.eup %4495 }
 0x1af   : > { %v637_v26 = vmul.f32 %v4496_v24, %v621_v6 }
 0x1b1   : > { %v645_v28 = vmul.f32 %v3912_v25, %v637_v26 }
 0x1b2   : > { %v4498_v29 = vpop.eup %4497 }
 0x1b3   : > { %v638_v30 = vmul.f32 %v4498_v29, %v622_v10  ;;  %v5104_v31 = vadd.f32 %v3913_v27, %v645_v28 }
 0x1b5   : > { %v646_v32 = vmul.f32 %v3912_v25, %v638_v30  ;;  %4182 = vmatprep.mubr.msk.f32.mxu0 %vm611_vm0, %v5104_v31 }
 0x1b7   : > { %v5108_v33 = vadd.f32 %v3913_v27, %v646_v32 }
 0x1b9   : > { %4183 = vmatmul.mubr.msk.f32.vlgmr.msra.gmra.mxu0 %vm611_vm0, %v5108_v33 }
 0x279   : > { %v4184_v35 = vpop.f32.mrf.mxu0 }
 0x27a   : > { %v5115_v36 = vadd.f32 %v4184_v35, %v3914_v34 }
 0x27b   : > { %v738_v37 = vpop.f32.mrf.mxu0 }
 0x27c   : > { %v5117_v38 = vadd.f32 %v3914_v34, %v738_v37  ;;  %756 = vrot.lane.b32.xlu0 %v5115_v36, %s4781_s0 }
 0x27e   : > { %754 = vrot.lane.b32.xlu1 %v5117_v38, %s4781_s0  ;;  %4189 = vmatprep.mubr.msk.f32.mxu1 %vm758_vm1, %v5117_v38 }
 0x2ee   : > { %v757_v39 = vpop.permute.xlu0 %756 }
 0x2ef   : > { %4185 = vmatprep.subr.msk.mxu1 %vm758_vm1, %v757_v39 }
 0x2f0   : > { %4186 = vmatpush3.xpose.msk.msra.mxu1 %vm758_vm1, %v757_v39  ;;  %v755_v40 = vpop.permute.xlu1 %754 }
 0x2f1   : > { %4187 = vmatprep.subr.msk.mxu1 %vm758_vm1, %v755_v40 }
 0x2f4   : > { %4188 = vmatpush3.xpose.msk.msra.mxu1 %vm758_vm1, %v755_v40 }
 0x2f7   : > { %4190 = vmatmul.mubr.msk.f32.vlgmr.msra.gmra.mxu1 %vm758_vm1, %v5115_v36 }
 0x3b7   : > { %v4191_v41 = vpop.f32.mrf.mxu1 }
 0x3b8   : > { %v843_v43 = vmul.f32 0.35355338, %v4191_v41 }
 0x3b9   : > { %v833_v44 = vpop.f32.mrf.mxu1 }
 0x3ba   : > { %v842_v46 = vmul.f32 0.35355338, %v833_v44  ;;  %v845_v47 = vadd.f32 %v843_v43, %v5132_v42 }
 0x3bc   : > { %v850_v48 = vsel %vm846_vm2, %v845_v47, -inf  ;;  %v844_v49 = vadd.f32 %v842_v46, %v5135_v45 }
 0x3bd   : > { %851 = vmax.xlane.f32.xlu0 %v850_v48 }
 0x3be   : > { %v847_v50 = vsel %vm846_vm2, %v844_v49, -inf }
 0x3bf   : > { %848 = vmax.xlane.f32.xlu1 %v847_v50 }
 0x446   : > { %v852_v51 = vpop.xlane.xlu0 %851 }
 0x447   : > { %v854_v52 = vsub.f32 %v845_v47, %v852_v51 }
 0x448   : > { %v849_v53 = vpop.xlane.xlu1 %848 }
 0x449   : > { %v857_v54 = vmul.f32 1.442695, %v854_v52  ;;  %v853_v55 = vsub.f32 %v844_v49, %v849_v53 }
 0x44b   : > { %4499 = vpow2.f32 %v857_v54  ;;  %v855_v56 = vmul.f32 1.442695, %v853_v55 }
 0x44d   : > { %4501 = vpow2.f32 %v855_v56 }
 0x458   : > { %v4500_v57 = vpop.eup %4499 }
 0x459   : > { %v862_v58 = vsel %vm846_vm2, %v4500_v57, 0.0 }
 0x45a   : > { %v4502_v59 = vpop.eup %4501  ;;  %863 = vadd.xlane.f32.xlu1 %v862_v58 }
 0x45b   : > { %v859_v60 = vsel %vm846_vm2, %v4502_v59, 0.0 }
 0x45c   : > { %860 = vadd.xlane.f32.xlu0 %v859_v60 }
 0x46b   : > { %869 = vrot.lane.b32.xlu1 %v5117_v38, %s4782_s21 }
 0x46f   : > { %1051 = vrot.lane.b32.xlu1 %v5115_v36, %s4783_s30 }
 0x472   : > { %871 = vrot.lane.b32.xlu0 %v5115_v36, %s4782_s21 }
 0x473   : > { %1049 = vrot.lane.b32.xlu1 %v5117_v38, %s4783_s30 }
 0x476   : > { %1045 = vrot.lane.b32.xlu0 %v5117_v38, %s4784_s14 }
 0x477   : > { %1047 = vrot.lane.b32.xlu1 %v5115_v36, %s4784_s14 }
 0x47a   : > { %1338 = vrot.lane.b32.xlu0 %v5115_v36, %s4785_s20 }
 0x47b   : > { %1336 = vrot.lane.b32.xlu1 %v5117_v38, %s4785_s20 }
 0x47e   : > { %1332 = vrot.lane.b32.xlu0 %v5117_v38, %s4786_s17 }
 0x47f   : > { %1334 = vrot.lane.b32.xlu1 %v5115_v36, %s4786_s17 }
 0x4e3   : > { %v864_v61 = vpop.xlane.xlu1 %863 }
 0x4e4   : > { %4503 = vrcp.f32 %v864_v61 }
 0x4e5   : > { %v861_v62 = vpop.xlane.xlu0 %860 }
 0x4e6   : > { %4505 = vrcp.f32 %v861_v62 }
 0x4e7   : > { %v870_v0 = vpop.permute.xlu1 %869 }
 0x4e9   : > { %v872_v63 = vpop.permute.xlu0 %871 }
 0x4ea   : > { %4192 = vmatprep.subr.mxu0 %v872_v63 }
 0x4eb   : > { %4193 = vmatpush3.msra.mxu0 %v872_v63  ;;  %v1052_v6 = vpop.permute.xlu1 %1051 }
 0x4ec   : > { %4194 = vmatprep.subr.mxu0 %v870_v0 }
 0x4ed   : > { %4195 = vmatpush3.msra.mxu0 %v870_v0  ;;  %v1046_v7 = vpop.permute.xlu0 %1045 }
 0x4ee   : > { %4199 = vmatprep.subr.mxu0 %v747_v1 }
 0x4ef   : > { %v1050_v9 = vpop.permute.xlu1 %1049 }
 0x4f1   : > { %v4504_v2 = vpop.eup %4503  ;;  %v1339_v11 = vpop.permute.xlu0 %1338 }
 0x4f2   : > { %v868_v5 = vmul.f32 %v4504_v2, %v4500_v57 }
 0x4f3   : > { %v4506_v3 = vpop.eup %4505  ;;  %v1048_v12 = vpop.permute.xlu1 %1047 }
 0x4f4   : > { %v866_v4 = vmul.f32 %v4506_v3, %v4502_v59 }
 0x4f5   : > { %v1333_v13 = vpop.permute.xlu0 %1332 }
 0x4f6   : > { %4196 = vmatprep.mubr.msk.f32.mxu0 %vm846_vm2, %v866_v4 }
 0x4f7   : > { %4197 = vmatmul.mubr.msk.f32.vlgmr.msra.gmra.mxu0 %vm846_vm2, %v868_v5  ;;  %v1337_v14 = vpop.permute.xlu1 %1336 }
 0x4f8   : > { %4200 = vmatpush3.msra.mxu0 %v747_v1 }
 0x4f9   : > { %4204 = vmatprep.subr.msk.mxu0 %vm758_vm1, %v1052_v6 }
 0x4fb   : > { %v1335_v15 = vpop.permute.xlu1 %1334 }
 0x5b7   : > { %v4198_v8 = vpop.f32.mrf.mxu0 }
 0x5b9   : > { %v947_v10 = vpop.f32.mrf.mxu0 }
 0x5ba   : > { %4201 = vmatprep.mubr.msk.f32.mxu0 %vm758_vm1, %v947_v10 }
 0x5bb   : > { %4202 = vmatmul.mubr.msk.f32.vlgmr.msra.gmra.mxu0 %vm758_vm1, %v4198_v8  ;;  %v748_v8 = vld [vmem:[%s5615_s6 + $0x8] sm:$0xff] }
 0x5bc   : > { %4205 = vmatpush3.xpose.msk.msra.mxu0 %vm758_vm1, %v1052_v6  ;;  %4208 = vmatprep.mubr.msk.f32.mxu0 %vm758_vm1, %v1046_v7 }
 0x5bd   : > { %4206 = vmatprep.subr.msk.mxu0 %vm758_vm1, %v1050_v9 }
 0x5c0   : > { %4207 = vmatpush3.xpose.msk.msra.mxu0 %vm758_vm1, %v1050_v9 }
 0x5c1   : > { %4223 = vmatprep.subr.msk.mxu0 %vm758_vm1, %v1339_v11 }
 0x5c3   : > { %4209 = vmatmul.mubr.msk.f32.vlgmr.msra.gmra.mxu0 %vm758_vm1, %v1048_v12 }
 0x5c4   : > { %4224 = vmatpush3.xpose.msk.msra.mxu0 %vm758_vm1, %v1339_v11  ;;  %4227 = vmatprep.mubr.msk.f32.mxu0 %vm758_vm1, %v1333_v13 }
 0x5c5   : > { %4225 = vmatprep.subr.msk.mxu0 %vm758_vm1, %v1337_v14 }
 0x5c8   : > { %4226 = vmatpush3.xpose.msk.msra.mxu0 %vm758_vm1, %v1337_v14 }
 0x5cb   : > { %4228 = vmatmul.mubr.msk.f32.vlgmr.msra.gmra.mxu0 %vm758_vm1, %v1335_v15 }
 0x67b   : > { %v5182_v16 = vpop.f32.mrf.mxu0 }
 0x67d   : > { %v5184_v17 = vpop.f32.mrf.mxu0 }
 0x683   : > { %v4210_v18 = vpop.f32.mrf.mxu0 }
 0x684   : > { %v1137_v19 = vmul.f32 0.35355338, %v4210_v18 }
 0x685   : > { %v1127_v20 = vpop.f32.mrf.mxu0 }
 0x686   : > { %v1136_v21 = vmul.f32 0.35355338, %v1127_v20  ;;  %v1139_v22 = vadd.f32 %v1137_v19, %v5132_v42 }
 0x688   : > { %v1143_v23 = vsel %vm846_vm2, %v1139_v22, -inf  ;;  %v1138_v24 = vadd.f32 %v1136_v21, %v5135_v45 }
 0x689   : > { %1144 = vmax.xlane.f32.xlu1 %v1143_v23 }
 0x68a   : > { %v1140_v25 = vsel %vm846_vm2, %v1138_v24, -inf }
 0x68b   : > { %1141 = vmax.xlane.f32.xlu0 %v1140_v25  ;;  %v4229_v26 = vpop.f32.mrf.mxu0 }
 0x68c   : > { %v1424_v27 = vmul.f32 0.35355338, %v4229_v26 }
 0x68d   : > { %v1414_v53 = vpop.f32.mrf.mxu0 }
 0x68e   : > { %v1426_v28 = vadd.f32 %v1424_v27, %v5132_v42  ;;  %v1423_v54 = vmul.f32 0.35355338, %v1414_v53 }
 0x690   : > { %v1430_v29 = vsel %vm846_vm2, %v1426_v28, -inf  ;;  %v1425_v55 = vadd.f32 %v1423_v54, %v5135_v45 }
 0x692   : > { %v1427_v56 = vsel %vm846_vm2, %v1425_v55, -inf }
 0x69a   : > { %1162 = vrot.lane.b32.xlu1 %v5117_v38, %s5651_s15 }
 0x69e   : > { %1625 = vrot.lane.b32.xlu1 %v5115_v36, %s5649_s16 }
 0x6a2   : > { %1623 = vrot.lane.b32.xlu1 %v5117_v38, %s5649_s16 }
 0x6a6   : > { %1621 = vrot.lane.b32.xlu1 %v5115_v36, %s5647_s28 }
 0x6ca   : > { %1431 = vmax.xlane.f32.xlu1 %v1430_v29  ;;  %v749_v29 = vld [vmem:[%s5615_s6 + $0x10] sm:$0xff] }
 0x6db   : > { %1449 = vrot.lane.b32.xlu1 %v5117_v38, %s5645_s19 }
 0x712   : > { %v1145_v30 = vpop.xlane.xlu1 %1144 }
 0x713   : > { %v1147_v32 = vsub.f32 %v1139_v22, %v1145_v30 }
 0x714   : > { %v1142_v34 = vpop.xlane.xlu0 %1141 }
 0x715   : > { %v1150_v35 = vmul.f32 1.442695, %v1147_v32  ;;  %v1146_v37 = vsub.f32 %v1138_v24, %v1142_v34 }
 0x716   : > { %v1163_v39 = vpop.permute.xlu1 %1162 }
 0x717   : > { %4507 = vpow2.f32 %v1150_v35  ;;  %v1148_v40 = vmul.f32 1.442695, %v1146_v37 }
 0x719   : > { %4509 = vpow2.f32 %v1148_v40 }
 0x71a   : > { %v1626_v41 = vpop.permute.xlu1 %1625 }
 0x71b   : > { %4242 = vmatprep.subr.msk.mxu0 %vm758_vm1, %v1626_v41 }
 0x71c   : > { %4243 = vmatpush3.xpose.msk.msra.mxu0 %vm758_vm1, %v1626_v41 }
 0x71e   : > { %v1624_v43 = vpop.permute.xlu1 %1623 }
 0x71f   : > { %4244 = vmatprep.subr.msk.mxu0 %vm758_vm1, %v1624_v43 }
 0x720   : > { %4245 = vmatpush3.xpose.msk.msra.mxu0 %vm758_vm1, %v1624_v43 }
 0x722   : > { %v1622_v49 = vpop.permute.xlu1 %1621 }
 0x724   : > { %v4508_v44 = vpop.eup %4507 }
 0x725   : > { %v1155_v46 = vsel %vm846_vm2, %v4508_v44, 0.0 }
 0x726   : > { %v4510_v47 = vpop.eup %4509  ;;  %1156 = vadd.xlane.f32.xlu0 %v1155_v46  ;;  %v3925_v46 = vld [vmem:[%s5616_s7] ss:$0 sm:$0xff] }
 0x727   : > { %v1152_v48 = vsel %vm846_vm2, %v4510_v47, 0.0 }
 0x72a   : > { %1153 = vadd.xlane.f32.xlu0 %v1152_v48 }
 0x740   : > { %1164 = vrot.lane.b32.xlu0 %v5115_v36, %s5651_s15 }
 0x744   : > { %1619 = vrot.lane.b32.xlu0 %v5117_v38, %s5647_s28  ;;  %s5684_s28 = sld [smem:[#allocation26_spill]] }
 0x753   : > { %v1432_v50 = vpop.xlane.xlu1 %1431 }
 0x754   : > { %v1434_v51 = vsub.f32 %v1426_v28, %v1432_v50 }
 0x756   : > { %v1437_v52 = vmul.f32 1.442695, %v1434_v51 }
 0x757   : > { %v1450_v24 = vpop.permute.xlu1 %1449 }
 0x758   : > { %4511 = vpow2.f32 %v1437_v52 }
 0x763   : > { %1428 = vmax.xlane.f32.xlu0 %v1427_v56 }
 0x765   : > { %v4512_v57 = vpop.eup %4511 }
 0x766   : > { %v1442_v58 = vsel %vm846_vm2, %v4512_v57, 0.0 }
 0x767   : > { %1443 = vadd.xlane.f32.xlu0 %v1442_v58 }
 0x7af   : > { %v1157_v59 = vpop.xlane.xlu0 %1156 }
 0x7b0   : > { %4513 = vrcp.f32 %v1157_v59 }
 0x7b3   : > { %v1154_v60 = vpop.xlane.xlu0 %1153 }
 0x7b4   : > { %4515 = vrcp.f32 %v1154_v60 }
 0x7b7   : > { %v1165_v61 = vpop.permute.xlu0 %1164 }
 0x7b8   : > { %4211 = vmatprep.subr.mxu1 %v1165_v61 }
 0x7b9   : > { %4212 = vmatpush3.msra.mxu1 %v1165_v61 }
 0x7ba   : > { %4213 = vmatprep.subr.mxu1 %v1163_v39 }
 0x7bb   : > { %v1620_v62 = vpop.permute.xlu0 %1619  ;;  %4214 = vmatpush3.msra.mxu1 %v1163_v39 }
 0x7bc   : > { %4246 = vmatprep.mubr.msk.f32.mxu0 %vm758_vm1, %v1620_v62  ;;  %4218 = vmatprep.subr.mxu1 %v748_v8 }
 0x7bd   : > { %4247 = vmatmul.mubr.msk.f32.vlgmr.msra.gmra.mxu0 %vm758_vm1, %v1622_v49  ;;  %v4514_v63 = vpop.eup %4513  ;;  %v1043_v49 = vadd.f32 %v3925_v46, %v5184_v17 }
 0x7be   : > { %v1161_v2 = vmul.f32 %v4514_v63, %v4508_v44 }
 0x7c1   : > { %v4516_v0 = vpop.eup %4515 }
 0x7c2   : > { %v1159_v1 = vmul.f32 %v4516_v0, %v4510_v47  ;;  %v1044_v47 = vadd.f32 %v5182_v16, %v3925_v46  ;;  %v750_v16 = vld [vmem:[%s5615_s6 + $0x18] sm:$0xff] }
 0x7c3   : > { %v2069_v46 = vld [vmem:[%s5621_s12 + $0x38] sm:$0xff] }
 0x7c4   : > { %4215 = vmatprep.mubr.msk.f32.mxu1 %vm846_vm2, %v1159_v1 }
 0x7c5   : > { %4216 = vmatmul.mubr.msk.f32.vlgmr.msra.gmra.mxu1 %vm846_vm2, %v1161_v2 }
 0x7c6   : > { %4219 = vmatpush3.msra.mxu1 %v748_v8 }
 0x7ec   : > { %v1429_v3 = vpop.xlane.xlu0 %1428 }
 0x7ed   : > { %v1433_v4 = vsub.f32 %v1425_v55, %v1429_v3 }
 0x7ef   : > { %v1435_v5 = vmul.f32 1.442695, %v1433_v4 }
 0x7f0   : > { %v1444_v19 = vpop.xlane.xlu0 %1443 }
 0x7f1   : > { %4517 = vpow2.f32 %v1435_v5 }
 0x7f2   : > { %4519 = vrcp.f32 %v1444_v19 }
 0x7fe   : > { %v4518_v6 = vpop.eup %4517 }
 0x7ff   : > { %v1439_v7 = vsel %vm846_vm2, %v4518_v6, 0.0  ;;  %v4520_v25 = vpop.eup %4519 }
 0x800   : > { %1440 = vadd.xlane.f32.xlu0 %v1439_v7  ;;  %v1448_v28 = vmul.f32 %v4520_v25, %v4512_v57 }
 0x816   : > { %1451 = vrot.lane.b32.xlu0 %v5115_v36, %s5645_s19  ;;  %s5683_s19 = sld [smem:[#allocation25_spill]] }
 0x87d   : > { %v4248_v9 = vpop.f32.mrf.mxu0 }
 0x87e   : > { %v1711_v10 = vmul.f32 0.35355338, %v4248_v9 }
 0x87f   : > { %v1701_v11 = vpop.f32.mrf.mxu0 }
 0x880   : > { %v1710_v12 = vmul.f32 0.35355338, %v1701_v11  ;;  %v1713_v13 = vadd.f32 %v1711_v10, %v5132_v42 }
 0x882   : > { %v1717_v14 = vsel %vm846_vm2, %v1713_v13, -inf  ;;  %v1712_v15 = vadd.f32 %v1710_v12, %v5135_v45 }
 0x883   : > { %1718 = vmax.xlane.f32.xlu0 %v1717_v14 }
 0x884   : > { %v1714_v18 = vsel %vm846_vm2, %v1712_v15, -inf }
 0x885   : > { %v4217_v20 = vpop.f32.mrf.mxu1  ;;  %1715 = vmax.xlane.f32.xlu1 %v1714_v18 }
 0x887   : > { %v1240_v21 = vpop.f32.mrf.mxu1 }
 0x888   : > { %4220 = vmatprep.mubr.msk.f32.mxu1 %vm758_vm1, %v1240_v21  ;;  %v1954_v21 = vld [vmem:[%s5619_s10 + $0x10] sm:$0xff] }
 0x889   : > { %4221 = vmatmul.mubr.msk.f32.vlgmr.msra.gmra.mxu1 %vm758_vm1, %v4217_v20  ;;  %v1441_v22 = vpop.xlane.xlu0 %1440 }
 0x88a   : > { %4521 = vrcp.f32 %v1441_v22  ;;  %v1953_v22 = vld [vmem:[%s5619_s10 + $0x8] sm:$0xff] }
 0x88d   : > { %v1452_v23 = vpop.permute.xlu0 %1451 }
 0x88e   : > { %4230 = vmatprep.subr.mxu1 %v1452_v23 }
 0x88f   : > { %4231 = vmatpush3.msra.mxu1 %v1452_v23  ;;  %v1952_v23 = vld [vmem:[%s5619_s10] sm:$0xff] }
 0x890   : > { %4232 = vmatprep.subr.mxu1 %v1450_v24 }
 0x891   : > { %4233 = vmatpush3.msra.mxu1 %v1450_v24 }
 0x892   : > { %4237 = vmatprep.subr.mxu1 %v749_v29 }
 0x897   : > { %v4522_v26 = vpop.eup %4521 }
 0x898   : > { %v1446_v27 = vmul.f32 %v4522_v26, %v4518_v6 }
 0x89a   : > { %4234 = vmatprep.mubr.msk.f32.mxu1 %vm846_vm2, %v1446_v27 }
 0x89b   : > { %4235 = vmatmul.mubr.msk.f32.vlgmr.msra.gmra.mxu1 %vm846_vm2, %v1448_v28 }
 0x89c   : > { %4238 = vmatpush3.msra.mxu1 %v749_v29 }
 0x90c   : > { %v1719_v30 = vpop.xlane.xlu0 %1718 }
 0x90d   : > { %v1721_v32 = vsub.f32 %v1713_v13, %v1719_v30 }
 0x90e   : > { %v1716_v34 = vpop.xlane.xlu1 %1715 }
 0x90f   : > { %v1724_v35 = vmul.f32 1.442695, %v1721_v32  ;;  %v1720_v37 = vsub.f32 %v1712_v15, %v1716_v34  ;;  %v3950_v32 = vld [vmem:[%s5617_s8] ss:$0 sm:$0xff] }
 0x911   : > { %4523 = vpow2.f32 %v1724_v35  ;;  %v1722_v39 = vmul.f32 1.442695, %v1720_v37 }
 0x913   : > { %4525 = vpow2.f32 %v1722_v39 }
 0x91e   : > { %v4524_v40 = vpop.eup %4523 }
 0x91f   : > { %v1729_v41 = vsel %vm846_vm2, %v4524_v40, 0.0 }
 0x920   : > { %v4526_v43 = vpop.eup %4525  ;;  %1730 = vadd.xlane.f32.xlu1 %v1729_v41 }
 0x921   : > { %v1726_v44 = vsel %vm846_vm2, %v4526_v43, 0.0 }
 0x922   : > { %1727 = vadd.xlane.f32.xlu0 %v1726_v44 }
 0x931   : > { %1736 = vrot.lane.b32.xlu1 %v5117_v38, %s5643_s29 }
 0x938   : > { %1738 = vrot.lane.b32.xlu0 %v5115_v36, %s5643_s29  ;;  %s4792_s29 = smov [#allocation10]  }
 0x939   : > { %s4701_s16 = sshll.u32 %s4792_s29, 4  ;;  %s4702_s16 = int_to_ptr.vmem [resolvable:$false] %s4701_s16 }
 0x93a   : > { %s4703_s15 = scalar_lea.vmem %s4702_s16, 512 }
 0x949   : > { %v4222_v48 = vpop.f32.mrf.mxu1 }
 0x94a   : > { %v1331_v50 = vadd.f32 %v4222_v48, %v1044_v47  ;;  %v2068_v47 = vld [vmem:[%s5621_s12 + $0x30] sm:$0xff]  ;;  %v2067_v48 = vld [vmem:[%s5621_s12 + $0x28] sm:$0xff] }
 0x94b   : > { %v1321_v51 = vpop.f32.mrf.mxu1 }
 0x94c   : > { %v1330_v52 = vadd.f32 %v1321_v51, %v1043_v49  ;;  %v2066_v49 = vld [vmem:[%s5621_s12 + $0x20] sm:$0xff]  ;;  %v2064_v51 = vld [vmem:[%s5621_s12 + $0x10] sm:$0xff] }
 0x95b   : > { %v4236_v53 = vpop.f32.mrf.mxu1 }
 0x95d   : > { %v1527_v54 = vpop.f32.mrf.mxu1 }
 0x95e   : > { %4239 = vmatprep.mubr.msk.f32.mxu1 %vm758_vm1, %v1527_v54  ;;  %v3952_v54 = vld [vmem:[%s5620_s11] ss:$0 sm:$0xff] }
 0x95f   : > { %4240 = vmatmul.mubr.msk.f32.vlgmr.msra.gmra.mxu1 %vm758_vm1, %v4236_v53  ;;  %v2062_v53 = vld [vmem:[%s5621_s12] sm:$0xff] }
 0x9a9   : > { %v1731_v38 = vpop.xlane.xlu1 %1730 }
 0x9aa   : > { %4527 = vrcp.f32 %v1731_v38 }
 0x9ab   : > { %v1728_v36 = vpop.xlane.xlu0 %1727 }
 0x9ac   : > { %4529 = vrcp.f32 %v1728_v36 }
 0x9ad   : > { %v1737_v56 = vpop.permute.xlu1 %1736 }
 0x9af   : > { %v1739_v55 = vpop.permute.xlu0 %1738 }
 0x9b0   : > { %4249 = vmatprep.subr.mxu1 %v1739_v55 }
 0x9b1   : > { %4250 = vmatpush3.msra.mxu1 %v1739_v55 }
 0x9b2   : > { %4251 = vmatprep.subr.mxu1 %v1737_v56 }
 0x9b3   : > { %4252 = vmatpush3.msra.mxu1 %v1737_v56 }
 0x9b4   : > { %4256 = vmatprep.subr.mxu1 %v750_v16 }
 0x9b7   : > { %v4528_v17 = vpop.eup %4527 }
 0x9b8   : > { %v1735_v59 = vmul.f32 %v4528_v17, %v4524_v40  ;;  %v3951_v40 = vld [vmem:[%s5618_s9] ss:$0 sm:$0xff] }
 0x9b9   : > { %v4530_v57 = vpop.eup %4529 }
 0x9ba   : > { %v1733_v58 = vmul.f32 %v4530_v57, %v4526_v43 }
 0x9bc   : > { %4253 = vmatprep.mubr.msk.f32.mxu1 %vm846_vm2, %v1733_v58 }
 0x9bd   : > { %4254 = vmatmul.mubr.msk.f32.vlgmr.msra.gmra.mxu1 %vm846_vm2, %v1735_v59 }
 0x9be   : > { %4257 = vmatpush3.msra.mxu1 %v750_v16 }
 0x9bf   : > { %4272 = vmatprep.subr.mxu1 %v2069_v46 }
 0xa1f   : > { %v4241_v60 = vpop.f32.mrf.mxu1 }
 0xa20   : > { %v1618_v61 = vadd.f32 %v4241_v60, %v1331_v50  ;;  %v2065_v50 = vld [vmem:[%s5621_s12 + $0x18] sm:$0xff] }
 0xa21   : > { %v1608_v62 = vpop.f32.mrf.mxu1 }
 0xa22   : > { %v1617_v2 = vadd.f32 %v1608_v62, %v1330_v52  ;;  %v2063_v52 = vld [vmem:[%s5621_s12 + $0x8] sm:$0xff] }
 0xa7d   : > { %v4255_v63 = vpop.f32.mrf.mxu1 }
 0xa7f   : > { %v1814_v0 = vpop.f32.mrf.mxu1 }
 0xa80   : > { %4258 = vmatprep.mubr.msk.f32.mxu1 %vm758_vm1, %v1814_v0 }
 0xa81   : > { %4259 = vmatmul.mubr.msk.f32.vlgmr.msra.gmra.mxu1 %vm758_vm1, %v4255_v63 }
 0xa82   : > { %4273 = vmatpush3.msra.mxu1 %v2069_v46 }
 0xa83   : > { %4274 = vmatprep.subr.mxu1 %v2068_v47 }
 0xa84   : > { %4275 = vmatpush3.msra.mxu1 %v2068_v47 }
 0xa85   : > { %4276 = vmatprep.subr.mxu1 %v2067_v48 }
 0xa86   : > { %4277 = vmatpush3.msra.mxu1 %v2067_v48 }
 0xa87   : > { %4278 = vmatprep.subr.mxu1 %v2066_v49 }
 0xa88   : > { %4279 = vmatpush3.msra.mxu1 %v2066_v49 }
 0xa89   : > { %4280 = vmatprep.subr.mxu1 %v2065_v50 }
 0xa8a   : > { %4281 = vmatpush3.msra.mxu1 %v2065_v50  ;;  %v3959_v50 = vld [vmem:[%s5685_s18] ss:$0 sm:$0xff] }
 0xa8b   : > { %4282 = vmatprep.subr.mxu1 %v2064_v51 }
 0xa8c   : > { %4283 = vmatpush3.msra.mxu1 %v2064_v51 }
 0xa8d   : > { %4284 = vmatprep.subr.mxu1 %v2063_v52 }
 0xa8e   : > { %4285 = vmatpush3.msra.mxu1 %v2063_v52 }
 0xa8f   : > { %4286 = vmatprep.subr.mxu1 %v2062_v53 }
 0xa90   : > { %4287 = vmatpush3.msra.mxu1 %v2062_v53 }
 0xb41   : > { %v4260_v1 = vpop.f32.mrf.mxu1 }
 0xb42   : > { %v1905_v3 = vadd.f32 %v4260_v1, %v1618_v61 }
 0xb43   : > { %v1895_v4 = vpop.f32.mrf.mxu1 }
 0xb44   : > { %v1904_v5 = vadd.f32 %v1895_v4, %v1617_v2  ;;  %v1907_v6 = vadd.f32 %v1905_v3, %v5108_v33 }
 0xb46   : > { %v1913_v7 = vsel %vm611_vm0, %v1907_v6, 0.0  ;;  %v1906_v8 = vadd.f32 %v1904_v5, %v5104_v31  ;;  %v1955_v31 = vld [vmem:[%s5619_s10 + $0x18] sm:$0xff] }
 0xb47   : > { %1914 = vadd.xlane.f32.xlu0 %v1913_v7  ;;  %4261 = vmatprep.subr.mxu0 %v1955_v31 }
 0xb48   : > { %v1910_v9 = vsel %vm611_vm0, %v1906_v8, 0.0  ;;  %4262 = vmatpush3.msra.mxu0 %v1955_v31 }
 0xb49   : > { %1911 = vadd.xlane.f32.xlu1 %v1910_v9  ;;  %4263 = vmatprep.subr.mxu0 %v1954_v21  ;;  %v3955_v9 = vld [vmem:[%s5683_s19] ss:$0 sm:$0xff] }
 0xb4a   : > { %4264 = vmatpush3.msra.mxu0 %v1954_v21 }
 0xb4b   : > { %4265 = vmatprep.subr.mxu0 %v1953_v22 }
 0xb4c   : > { %4266 = vmatpush3.msra.mxu0 %v1953_v22 }
 0xb4d   : > { %4267 = vmatprep.subr.mxu0 %v1952_v23 }
 0xb4e   : > { %4268 = vmatpush3.msra.mxu0 %v1952_v23 }
 0xbd0   : > { %v1915_v10 = vpop.xlane.xlu0 %1914 }
 0xbd1   : > { %v1917_v11 = vmul.f32 0.03125, %v1915_v10 }
 0xbd2   : > { %v1912_v12 = vpop.xlane.xlu1 %1911 }
 0xbd3   : > { %v1919_v13 = vsub.f32 %v1907_v6, %v1917_v11  ;;  %v1916_v14 = vmul.f32 0.03125, %v1912_v12 }
 0xbd5   : > { %v1918_v15 = vsub.f32 %v1906_v8, %v1916_v14  ;;  %v1921_v18 = vmul.f32 %v1919_v13, %v1919_v13 }
 0xbd7   : > { %v1925_v19 = vsel %vm611_vm0, %v1921_v18, 0.0  ;;  %v1920_v20 = vmul.f32 %v1918_v15, %v1918_v15 }
 0xbd8   : > { %1926 = vadd.xlane.f32.xlu1 %v1925_v19 }
 0xbd9   : > { %v1922_v33 = vsel %vm611_vm0, %v1920_v20, 0.0 }
 0xbda   : > { %1923 = vadd.xlane.f32.xlu0 %v1922_v33 }
 0xc61   : > { %v1927_v24 = vpop.xlane.xlu1 %1926 }
 0xc62   : > { %v1929_v25 = vmul.f32 0.03125, %v1927_v24 }
 0xc63   : > { %v1924_v26 = vpop.xlane.xlu0 %1923 }
 0xc64   : > { %v1931_v27 = vadd.f32 1e-05, %v1929_v25  ;;  %v1928_v28 = vmul.f32 0.03125, %v1924_v26 }
 0xc66   : > { %4531 = vrsqrt.f32 %v1931_v27  ;;  %v1930_v29 = vadd.f32 1e-05, %v1928_v28  ;;  %v3963_v28 = vld [vmem:[%s5613_s4 + $0x38] sm:$0xff] }
 0xc67   : > { %4291 = vmatprep.subr.mxu0 %v3963_v28 }
 0xc68   : > { %4533 = vrsqrt.f32 %v1930_v29  ;;  %v3962_v29 = vld [vmem:[%s5613_s4 + $0x30] sm:$0xff] }
 0xc73   : > { %v4532_v30 = vpop.eup %4531 }
 0xc74   : > { %v1935_v34 = vmul.f32 %v4532_v30, %v1919_v13  ;;  %v3961_v30 = vld [vmem:[%s5613_s4 + $0x28] sm:$0xff] }
 0xc75   : > { %v4534_v35 = vpop.eup %4533 }
 0xc76   : > { %v1934_v37 = vmul.f32 %v4534_v35, %v1918_v15  ;;  %v1943_v39 = vmul.f32 %v3950_v32, %v1935_v34 }
 0xc78   : > { %v1942_v41 = vmul.f32 %v3950_v32, %v1934_v37  ;;  %v1951_v44 = vadd.f32 %v3951_v40, %v1943_v39  ;;  %v3960_v32 = vld [vmem:[%s5613_s4 + $0x20] sm:$0xff] }
 0xc7a   : > { %v5280_v43 = vadd.f32 %v3951_v40, %v1942_v41 }
 0xc7c   : > { %4269 = vmatprep.mubr.msk.f32.mxu0 %vm611_vm0, %v5280_v43 }
 0xc7d   : > { %4270 = vmatmul.mubr.msk.f32.vlgmr.msra.gmra.mxu0 %vm611_vm0, %v1951_v44 }
 0xc7e   : > { %4292 = vmatpush3.msra.mxu0 %v3963_v28 }
 0xc7f   : > { %4293 = vmatprep.subr.mxu0 %v3962_v29 }
 0xc80   : > { %4294 = vmatpush3.msra.mxu0 %v3962_v29 }
 0xc81   : > { %4295 = vmatprep.subr.mxu0 %v3961_v30 }
 0xc82   : > { %4296 = vmatpush3.msra.mxu0 %v3961_v30 }
 0xc83   : > { %4297 = vmatprep.subr.mxu0 %v3960_v32 }
 0xc84   : > { %4298 = vmatpush3.msra.mxu0 %v3960_v32 }
 0xd3d   : > { %v4271_v38 = vpop.f32.mrf.mxu0 }
 0xd3e   : > { %v2041_v36 = vadd.f32 %v4271_v38, %v3952_v54 }
 0xd3f   : > { %v2035_v55 = vpop.f32.mrf.mxu0 }
 0xd40   : > { %v2047_v56 = vmul.f32 0.044715, %v2041_v36  ;;  %v2036_v16 = vadd.f32 %v3952_v54, %v2035_v55  ;;  %v2045_v6 = vmul.f32 0.5, %v2041_v36  ;;  %v3965_v54 = vld [vmem:[%s5614_s5 + $0x1] ss:$0 sm:$0xff] }
 0xd42   : > { %v2049_v17 = vmul.f32 %v2047_v56, %v2041_v36  ;;  %v2046_v57 = vmul.f32 0.044715, %v2036_v16  ;;  %v2044_v4 = vmul.f32 0.5, %v2036_v16 }
 0xd44   : > { %v2051_v58 = vmul.f32 %v2049_v17, %v2041_v36  ;;  %v2048_v59 = vmul.f32 %v2046_v57, %v2036_v16 }
 0xd46   : > { %v2053_v60 = vadd.f32 %v2051_v58, %v2041_v36  ;;  %v2050_v61 = vmul.f32 %v2048_v59, %v2036_v16 }
 0xd48   : > { %v2055_v62 = vmul.f32 0.7978846, %v2053_v60  ;;  %v2052_v63 = vadd.f32 %v2050_v61, %v2036_v16 }
 0xd4a   : > { %4535 = vtanh.f32 %v2055_v62  ;;  %v2054_v0 = vmul.f32 0.7978846, %v2052_v63 }
 0xd4c   : > { %4537 = vtanh.f32 %v2054_v0 }
 0xd57   : > { %v4536_v1 = vpop.eup %4535 }
 0xd58   : > { %v2059_v3 = vadd.f32 1.0, %v4536_v1 }
 0xd59   : > { %v4538_v2 = vpop.eup %4537 }
 0xd5a   : > { %v2058_v5 = vadd.f32 1.0, %v4538_v2  ;;  %v2061_v8 = vmul.f32 %v2059_v3, %v2045_v6 }
 0xd5c   : > { %v2060_v7 = vmul.f32 %v2058_v5, %v2044_v4 }
 0xd5e   : > { %4288 = vmatprep.mubr.msk.f32.mxu1 %vm2077_vm3, %v2060_v7 }
 0xd5f   : > { %4289 = vmatmul.mubr.msk.f32.vlgmr.msra.gmra.mxu1 %vm2077_vm3, %v2061_v8 }
 0xe1f   : > { %v4290_v10 = vpop.f32.mrf.mxu1 }
 0xe20   : > { %v2156_v11 = vadd.f32 %v4290_v10, %v3955_v9 }
 0xe21   : > { %v2150_v12 = vpop.f32.mrf.mxu1 }
 0xe22   : > { %v2151_v13 = vadd.f32 %v3955_v9, %v2150_v12  ;;  %v2160_v14 = vadd.f32 %v2156_v11, %v1951_v44  ;;  %v3958_v44 = vld [vmem:[%s5684_s28] ss:$0 sm:$0xff] }
 0xe24   : > { %v2166_v15 = vsel %vm611_vm0, %v2160_v14, 0.0  ;;  %v2159_v18 = vadd.f32 %v2151_v13, %v5280_v43 }
 0xe25   : > { %2167 = vadd.xlane.f32.xlu1 %v2166_v15 }
 0xe26   : > { %v2163_v19 = vsel %vm611_vm0, %v2159_v18, 0.0 }
 0xe27   : > { %2164 = vadd.xlane.f32.xlu0 %v2163_v19 }
 0xeae   : > { %v2168_v20 = vpop.xlane.xlu1 %2167 }
 0xeaf   : > { %v2170_v33 = vmul.f32 0.03125, %v2168_v20 }
 0xeb0   : > { %v2165_v31 = vpop.xlane.xlu0 %2164 }
 0xeb1   : > { %v2172_v21 = vsub.f32 %v2160_v14, %v2170_v33  ;;  %v2169_v22 = vmul.f32 0.03125, %v2165_v31 }
 0xeb3   : > { %v2171_v23 = vsub.f32 %v2159_v18, %v2169_v22  ;;  %v2174_v24 = vmul.f32 %v2172_v21, %v2172_v21 }
 0xeb5   : > { %v2178_v25 = vsel %vm611_vm0, %v2174_v24, 0.0  ;;  %v2173_v26 = vmul.f32 %v2171_v23, %v2171_v23 }
 0xeb6   : > { %2179 = vadd.xlane.f32.xlu1 %v2178_v25 }
 0xeb7   : > { %v2175_v27 = vsel %vm611_vm0, %v2173_v26, 0.0 }
 0xeb8   : > { %2176 = vadd.xlane.f32.xlu0 %v2175_v27 }
 0xf3f   : > { %v2180_v34 = vpop.xlane.xlu1 %2179 }
 0xf40   : > { %v2182_v35 = vmul.f32 0.03125, %v2180_v34 }
 0xf41   : > { %v2177_v37 = vpop.xlane.xlu0 %2176 }
 0xf42   : > { %v2184_v39 = vadd.f32 1e-05, %v2182_v35  ;;  %v2181_v40 = vmul.f32 0.03125, %v2177_v37 }
 0xf44   : > { %4539 = vrsqrt.f32 %v2184_v39  ;;  %v2183_v41 = vadd.f32 1e-05, %v2181_v40 }
 0xf46   : > { %4541 = vrsqrt.f32 %v2183_v41 }
 0xf51   : > { %v4540_v43 = vpop.eup %4539 }
 0xf52   : > { %v2188_v46 = vmul.f32 %v4540_v43, %v2172_v21 }
 0xf53   : > { %v4542_v47 = vpop.eup %4541 }
 0xf54   : > { %v2187_v48 = vmul.f32 %v4542_v47, %v2171_v23  ;;  %v2196_v49 = vmul.f32 %v3958_v44, %v2188_v46 }
 0xf56   : > { %v2195_v51 = vmul.f32 %v3958_v44, %v2187_v48  ;;  %v5342_v53 = vadd.f32 %v3959_v50, %v2196_v49 }
 0xf58   : > { %v5340_v52 = vadd.f32 %v3959_v50, %v2195_v51 }
 0xf5a   : > { %4299 = vmatprep.mubr.msk.f32.mxu0 %vm611_vm0, %v5340_v52 }
 0xf5b   : > { %4300 = vmatmul.mubr.msk.f32.vlgmr.msra.gmra.mxu0 %vm611_vm0, %v5342_v53 }
0x101b   : > { %v4301_v38 = vpop.f32.mrf.mxu0 }
0x101c   : > { %v5351_v36 = vadd.f32 %v4301_v38, %v3965_v54 }
0x101d   : > { %v2290_v55 = vpop.f32.mrf.mxu0 }
0x101e   : > { %v5353_v56 = vadd.f32 %v3965_v54, %v2290_v55  ;;  %2310 = vrot.lane.b32.xlu0 %v5351_v36, %s4781_s0  ;;  %v3968_v54 = vld [vmem:[%s5615_s6 + $0x20] sm:$0xff] }
0x1020   : > { %2308 = vrot.lane.b32.xlu1 %v5353_v56, %s4781_s0  ;;  %4306 = vmatprep.mubr.msk.f32.mxu0 %vm758_vm1, %v5353_v56  ;;  %s5686_s0 = smov 56  }
0x1022   : > { %2597 = vrot.lane.b32.xlu0 %v5353_v56, %s4784_s14 }
0x1024   : > { %2603 = vrot.lane.b32.xlu1 %v5351_v36, %s4783_s30 }
0x1028   : > { %2601 = vrot.lane.b32.xlu1 %v5353_v56, %s4783_s30  ;;  %s5687_s30 = smov 72  }
0x102c   : > { %2599 = vrot.lane.b32.xlu1 %v5351_v36, %s4784_s14  ;;  %s5688_s14 = smov 104  }
0x1090   : > { %v2311_v16 = vpop.permute.xlu0 %2310 }
0x1091   : > { %4302 = vmatprep.subr.msk.mxu0 %vm758_vm1, %v2311_v16 }
0x1092   : > { %4303 = vmatpush3.xpose.msk.msra.mxu0 %vm758_vm1, %v2311_v16  ;;  %v2309_v17 = vpop.permute.xlu1 %2308 }
0x1093   : > { %4304 = vmatprep.subr.msk.mxu0 %vm758_vm1, %v2309_v17 }
0x1094   : > { %v2598_v58 = vpop.permute.xlu0 %2597 }
0x1096   : > { %4305 = vmatpush3.xpose.msk.msra.mxu0 %vm758_vm1, %v2309_v17  ;;  %v2604_v57 = vpop.permute.xlu1 %2603 }
0x1097   : > { %4321 = vmatprep.subr.msk.mxu0 %vm758_vm1, %v2604_v57 }
0x1099   : > { %4307 = vmatmul.mubr.msk.f32.vlgmr.msra.gmra.mxu0 %vm758_vm1, %v5351_v36 }
0x109a   : > { %v2602_v59 = vpop.permute.xlu1 %2601  ;;  %4322 = vmatpush3.xpose.msk.msra.mxu0 %vm758_vm1, %v2604_v57  ;;  %4325 = vmatprep.mubr.msk.f32.mxu0 %vm758_vm1, %v2598_v58  ;;  %v4587_v57 = vld [vmem:[%s5074_s3 + $0x8] sm:$0xff] }
0x109b   : > { %4323 = vmatprep.subr.msk.mxu0 %vm758_vm1, %v2602_v59 }
0x109e   : > { %4324 = vmatpush3.xpose.msk.msra.mxu0 %vm758_vm1, %v2602_v59  ;;  %v2600_v60 = vpop.permute.xlu1 %2599 }
0x10a1   : > { %4326 = vmatmul.mubr.msk.f32.vlgmr.msra.gmra.mxu0 %vm758_vm1, %v2600_v60  ;;  %v4588_v60 = vld [vmem:[%s5074_s3] sm:$0xff]  ;;  %s5689_s3 = smov 48  }
0x1159   : > { %v4308_v61 = vpop.f32.mrf.mxu0 }
0x115a   : > { %v2396_v62 = vmul.f32 0.35355338, %v4308_v61 }
0x115b   : > { %v2386_v63 = vpop.f32.mrf.mxu0 }
0x115c   : > { %v2395_v0 = vmul.f32 0.35355338, %v2386_v63  ;;  %v2398_v1 = vadd.f32 %v2396_v62, %v5132_v42 }
0x115e   : > { %v2402_v2 = vsel %vm846_vm2, %v2398_v1, -inf  ;;  %v2397_v3 = vadd.f32 %v2395_v0, %v5135_v45 }
0x115f   : > { %2403 = vmax.xlane.f32.xlu1 %v2402_v2 }
0x1160   : > { %v2399_v4 = vsel %vm846_vm2, %v2397_v3, -inf }
0x1161   : > { %2400 = vmax.xlane.f32.xlu0 %v2399_v4  ;;  %v4327_v5 = vpop.f32.mrf.mxu0 }
0x1162   : > { %v2689_v6 = vmul.f32 0.35355338, %v4327_v5 }
0x1163   : > { %v2679_v25 = vpop.f32.mrf.mxu0 }
0x1164   : > { %v2691_v7 = vadd.f32 %v2689_v6, %v5132_v42  ;;  %v2688_v27 = vmul.f32 0.35355338, %v2679_v25 }
0x1166   : > { %v2695_v8 = vsel %vm846_vm2, %v2691_v7, -inf  ;;  %v2690_v29 = vadd.f32 %v2688_v27, %v5135_v45 }
0x1168   : > { %v2692_v30 = vsel %vm846_vm2, %v2690_v29, -inf }
0x1170   : > { %2421 = vrot.lane.b32.xlu1 %v5353_v56, %s4782_s21 }
0x1174   : > { %2890 = vrot.lane.b32.xlu1 %v5351_v36, %s4785_s20 }
0x1178   : > { %2888 = vrot.lane.b32.xlu1 %v5353_v56, %s4785_s20 }
0x117c   : > { %2886 = vrot.lane.b32.xlu1 %v5351_v36, %s4786_s17 }
0x11a0   : > { %2696 = vmax.xlane.f32.xlu1 %v2695_v8 }
0x11b1   : > { %2714 = vrot.lane.b32.xlu1 %v5353_v56, %s5686_s0 }
0x11b5   : > { %3177 = vrot.lane.b32.xlu1 %v5351_v36, %s5687_s30 }
0x11b9   : > { %3175 = vrot.lane.b32.xlu1 %v5353_v56, %s5687_s30  ;;  %s604_s30 = scalar_lea.vmem [#allocation10], %s5064_s2 }
0x11bd   : > { %3173 = vrot.lane.b32.xlu1 %v5351_v36, %s5688_s14 }
0x11e8   : > { %v2404_v9 = vpop.xlane.xlu1 %2403 }
0x11e9   : > { %v2406_v10 = vsub.f32 %v2398_v1, %v2404_v9 }
0x11ea   : > { %v2401_v11 = vpop.xlane.xlu0 %2400 }
0x11eb   : > { %v2409_v12 = vmul.f32 1.442695, %v2406_v10  ;;  %v2405_v42 = vsub.f32 %v2397_v3, %v2401_v11  ;;  %v3969_v10 = vld [vmem:[%s5615_s6 + $0x28] sm:$0xff] }
0x11ec   : > { %v2422_v13 = vpop.permute.xlu1 %2421 }
0x11ed   : > { %4543 = vpow2.f32 %v2409_v12  ;;  %v2407_v14 = vmul.f32 1.442695, %v2405_v42 }
0x11ef   : > { %4545 = vpow2.f32 %v2407_v14 }
0x11f0   : > { %v2891_v15 = vpop.permute.xlu1 %2890 }
0x11f1   : > { %4340 = vmatprep.subr.msk.mxu0 %vm758_vm1, %v2891_v15 }
0x11f2   : > { %4341 = vmatpush3.xpose.msk.msra.mxu0 %vm758_vm1, %v2891_v15 }
0x11f4   : > { %v2889_v18 = vpop.permute.xlu1 %2888 }
0x11f5   : > { %4342 = vmatprep.subr.msk.mxu0 %vm758_vm1, %v2889_v18 }
0x11f6   : > { %4343 = vmatpush3.xpose.msk.msra.mxu0 %vm758_vm1, %v2889_v18 }
0x11f8   : > { %v2887_v21 = vpop.permute.xlu1 %2886 }
0x11fa   : > { %v4544_v19 = vpop.eup %4543 }
0x11fb   : > { %v2414_v20 = vsel %vm846_vm2, %v4544_v19, 0.0 }
0x11fc   : > { %v4546_v33 = vpop.eup %4545  ;;  %2415 = vadd.xlane.f32.xlu0 %v2414_v20 }
0x11fd   : > { %v2411_v31 = vsel %vm846_vm2, %v4546_v33, 0.0 }
0x1200   : > { %2412 = vadd.xlane.f32.xlu0 %v2411_v31 }
0x1216   : > { %2423 = vrot.lane.b32.xlu0 %v5351_v36, %s4782_s21 }
0x121a   : > { %2884 = vrot.lane.b32.xlu0 %v5353_v56, %s4786_s17 }
0x1229   : > { %v2697_v22 = vpop.xlane.xlu1 %2696 }
0x122a   : > { %v2699_v23 = vsub.f32 %v2691_v7, %v2697_v22 }
0x122c   : > { %v2702_v24 = vmul.f32 1.442695, %v2699_v23 }
0x122d   : > { %v5413_v26 = vpop.permute.xlu1 %2714 }
0x122e   : > { %4547 = vpow2.f32 %v2702_v24 }
0x1231   : > { %v3178_v28 = vpop.permute.xlu1 %3177 }
0x1232   : > { %4359 = vmatprep.subr.msk.mxu0 %vm758_vm1, %v3178_v28 }
0x1235   : > { %v3176_v45 = vpop.permute.xlu1 %3175 }
0x1239   : > { %2693 = vmax.xlane.f32.xlu0 %v2692_v30  ;;  %v3174_v5 = vpop.permute.xlu1 %3173 }
0x123b   : > { %v5418_v32 = vpop.eup %4547 }
0x123c   : > { %v2707_v34 = vsel %vm846_vm2, %v5418_v32, 0.0 }
0x123d   : > { %2708 = vadd.xlane.f32.xlu0 %v2707_v34 }
0x1285   : > { %v2416_v35 = vpop.xlane.xlu0 %2415 }
0x1286   : > { %4549 = vrcp.f32 %v2416_v35 }
0x1289   : > { %v2413_v37 = vpop.xlane.xlu0 %2412 }
0x128a   : > { %4551 = vrcp.f32 %v2413_v37 }
0x128d   : > { %v2424_v39 = vpop.permute.xlu0 %2423 }
0x128e   : > { %4309 = vmatprep.subr.mxu1 %v2424_v39 }
0x128f   : > { %4310 = vmatpush3.msra.mxu1 %v2424_v39 }
0x1290   : > { %4311 = vmatprep.subr.mxu1 %v2422_v13 }
0x1291   : > { %4312 = vmatpush3.msra.mxu1 %v2422_v13  ;;  %v2885_v40 = vpop.permute.xlu0 %2884 }
0x1292   : > { %4344 = vmatprep.mubr.msk.f32.mxu0 %vm758_vm1, %v2885_v40  ;;  %4316 = vmatprep.subr.mxu1 %v3968_v54 }
0x1293   : > { %4345 = vmatmul.mubr.msk.f32.vlgmr.msra.gmra.mxu0 %vm758_vm1, %v2887_v21  ;;  %v4550_v41 = vpop.eup %4549 }
0x1294   : > { %4360 = vmatpush3.xpose.msk.msra.mxu0 %vm758_vm1, %v3178_v28  ;;  %v2420_v46 = vmul.f32 %v4550_v41, %v4544_v19 }
0x1295   : > { %4361 = vmatprep.subr.msk.mxu0 %vm758_vm1, %v3176_v45 }
0x1297   : > { %v4552_v43 = vpop.eup %4551 }
0x1298   : > { %4362 = vmatpush3.xpose.msk.msra.mxu0 %vm758_vm1, %v3176_v45  ;;  %v2418_v44 = vmul.f32 %v4552_v43, %v4546_v33 }
0x129a   : > { %4313 = vmatprep.mubr.msk.f32.mxu1 %vm846_vm2, %v2418_v44 }
0x129b   : > { %4314 = vmatmul.mubr.msk.f32.vlgmr.msra.gmra.mxu1 %vm846_vm2, %v2420_v46 }
0x129c   : > { %4317 = vmatpush3.msra.mxu1 %v3968_v54 }
0x12c2   : > { %v2694_v47 = vpop.xlane.xlu0 %2693 }
0x12c3   : > { %v2698_v48 = vsub.f32 %v2690_v29, %v2694_v47 }
0x12c5   : > { %v2700_v49 = vmul.f32 1.442695, %v2698_v48 }
0x12c6   : > { %v2709_v63 = vpop.xlane.xlu0 %2708 }
0x12c7   : > { %4553 = vpow2.f32 %v2700_v49 }
0x12c8   : > { %4555 = vrcp.f32 %v2709_v63 }
0x12d4   : > { %v4554_v50 = vpop.eup %4553 }
0x12d5   : > { %v2704_v51 = vsel %vm846_vm2, %v4554_v50, 0.0  ;;  %v4556_v6 = vpop.eup %4555 }
0x12d6   : > { %2705 = vadd.xlane.f32.xlu0 %v2704_v51  ;;  %v2713_v9 = vmul.f32 %v4556_v6, %v5418_v32 }
0x12ec   : > { %2716 = vrot.lane.b32.xlu0 %v5351_v36, %s5686_s0  ;;  %s4041_s0 = sshll.u32 %s4901_s25, 8  ;;  %s3767_s25 = scalar_lea.sflag [#allocation4], %s5061_s13 }
0x12f0   : > { %3171 = vrot.lane.b32.xlu0 %v5353_v56, %s5688_s14  ;;  %s3780_s14 = sshll.u32 %s604_s30, 4  ;;  %s5564_s14 = int_to_ptr.vmem [resolvable:$true] %s3780_s14 }
0x12f1   : > { %s4697_s2 = scalar_lea.vmem %s5564_s14, 256  ;;  %p4704_p2 = scmp.lt.s32.totalorder %s5564_s14, %s4702_s16 }
0x12f2   : > { %p4698_p1 = scmp.ne.s32.totalorder %s5564_s14, %s4697_s2  ;;  %p4705_p4 = scmp.lt.s32.totalorder %s4703_s15, %s4697_s2 }
0x12f4   : > { %p4699_p11 = pnand %p4698_p1, %p5693_p12  ;;  %p4706_p6 = por %p4705_p4, %p4704_p2 }
0x12f6   : > { %p4700_p7 = pneg %p4699_p11 }
0x12f8   : > { %p4707_p0 = pnand %p4706_p6, %p4700_p7 }
0x1353   : > { %v4346_v38 = vpop.f32.mrf.mxu0 }
0x1354   : > { %v2976_v55 = vmul.f32 0.35355338, %v4346_v38 }
0x1355   : > { %v2966_v16 = vpop.f32.mrf.mxu0 }
0x1356   : > { %v2975_v17 = vmul.f32 0.35355338, %v2966_v16  ;;  %v2978_v58 = vadd.f32 %v4587_v57, %v2976_v55  ;;  %v3970_v16 = vld [vmem:[%s5615_s6 + $0x30] sm:$0xff] }
0x1358   : > { %v2982_v59 = vsel %vm846_vm2, %v2978_v58, -inf  ;;  %v2977_v61 = vadd.f32 %v4588_v60, %v2975_v17  ;;  %v3981_v17 = vld [vmem:[%s5616_s7 + $0x1] ss:$0 sm:$0xff] }
0x1359   : > { %2983 = vmax.xlane.f32.xlu1 %v2982_v59 }
0x135a   : > { %v2979_v62 = vsel %vm846_vm2, %v2977_v61, -inf }
0x135b   : > { %v4315_v0 = vpop.f32.mrf.mxu1  ;;  %2980 = vmax.xlane.f32.xlu0 %v2979_v62 }
0x135d   : > { %v2499_v1 = vpop.f32.mrf.mxu1 }
0x135e   : > { %4318 = vmatprep.mubr.msk.f32.mxu1 %vm758_vm1, %v2499_v1 }
0x135f   : > { %4319 = vmatmul.mubr.msk.f32.vlgmr.msra.gmra.mxu1 %vm758_vm1, %v4315_v0  ;;  %v2706_v2 = vpop.xlane.xlu0 %2705 }
0x1360   : > { %4557 = vrcp.f32 %v2706_v2 }
0x1363   : > { %v2717_v3 = vpop.permute.xlu0 %2716 }
0x1364   : > { %4328 = vmatprep.subr.mxu1 %v2717_v3 }
0x1365   : > { %4329 = vmatpush3.msra.mxu1 %v2717_v3 }
0x1366   : > { %4330 = vmatprep.subr.mxu1 %v5413_v26 }
0x1367   : > { %4331 = vmatpush3.msra.mxu1 %v5413_v26  ;;  %v3172_v4 = vpop.permute.xlu0 %3171 }
0x1368   : > { %4363 = vmatprep.mubr.msk.f32.mxu0 %vm758_vm1, %v3172_v4  ;;  %4335 = vmatprep.subr.mxu1 %v3969_v10 }
0x1369   : > { %4364 = vmatmul.mubr.msk.f32.vlgmr.msra.gmra.mxu0 %vm758_vm1, %v3174_v5  ;;  %v3971_v5 = vld [vmem:[%s5615_s6 + $0x38] sm:$0xff] }
0x136a   : > { %3001 = vrot.lane.b32.xlu1 %v5353_v56, %s5689_s3 }
0x136d   : > { %v4558_v7 = vpop.eup %4557 }
0x136e   : > { %v2711_v8 = vmul.f32 %v4558_v7, %v4554_v50 }
0x1370   : > { %4332 = vmatprep.mubr.msk.f32.mxu1 %vm846_vm2, %v2711_v8 }
0x1371   : > { %4333 = vmatmul.mubr.msk.f32.vlgmr.msra.gmra.mxu1 %vm846_vm2, %v2713_v9 }
0x1372   : > { %4336 = vmatpush3.msra.mxu1 %v3969_v10 }
0x13e2   : > { %v2984_v11 = vpop.xlane.xlu1 %2983 }
0x13e3   : > { %v2986_v12 = vsub.f32 %v2978_v58, %v2984_v11 }
0x13e4   : > { %v2981_v42 = vpop.xlane.xlu0 %2980 }
0x13e5   : > { %v2989_v13 = vmul.f32 1.442695, %v2986_v12  ;;  %v2985_v14 = vsub.f32 %v2977_v61, %v2981_v42 }
0x13e6   : > { %v3002_v39 = vpop.permute.xlu1 %3001 }
0x13e7   : > { %4559 = vpow2.f32 %v2989_v13  ;;  %v2987_v15 = vmul.f32 1.442695, %v2985_v14 }
0x13e9   : > { %4561 = vpow2.f32 %v2987_v15 }
0x13f4   : > { %v4560_v18 = vpop.eup %4559 }
0x13f5   : > { %v2994_v19 = vsel %vm846_vm2, %v4560_v18, 0.0 }
0x13f6   : > { %v4562_v20 = vpop.eup %4561  ;;  %2995 = vadd.xlane.f32.xlu0 %v2994_v19 }
0x13f7   : > { %v2991_v33 = vsel %vm846_vm2, %v4562_v20, 0.0 }
0x13fa   : > { %2992 = vadd.xlane.f32.xlu0 %v2991_v33 }
0x1410   : > { %3003 = vrot.lane.b32.xlu0 %v5351_v36, %s5689_s3  ;;  %s5692_s3 = sld [smem:[#allocation28_spill]] }
0x1416   : > { %s5562_s17 = scalar_lea.hbm %s5692_s3, %s4041_s0 }
0x141f   : > { %v4320_v22 = vpop.f32.mrf.mxu1 }
0x1421   : > { %v5460_v28 = vpop.f32.mrf.mxu1 }
0x1422   : > { %v2595_v6 = vadd.f32 %v3981_v17, %v5460_v28 }
0x1429   : > { %v4365_v31 = vpop.f32.mrf.mxu0 }
0x142a   : > { %v3263_v21 = vmul.f32 0.35355338, %v4365_v31 }
0x142b   : > { %v3253_v23 = vpop.f32.mrf.mxu0 }
0x142c   : > { %v3262_v24 = vmul.f32 0.35355338, %v3253_v23  ;;  %v3265_v25 = vadd.f32 %v4587_v57, %v3263_v21  ;;  %v2596_v57 = vadd.f32 %v4320_v22, %v3981_v17  ;;  %v4023_v17 = vld [vmem:[%s5621_s12 + $0x68] sm:$0xff] }
0x142e   : > { %v3269_v26 = vsel %vm846_vm2, %v3265_v25, -inf  ;;  %v3264_v27 = vadd.f32 %v4588_v60, %v3262_v24 }
0x142f   : > { %3270 = vmax.xlane.f32.xlu0 %v3269_v26 }
0x1430   : > { %v3266_v29 = vsel %vm846_vm2, %v3264_v27, -inf }
0x1431   : > { %v4334_v30 = vpop.f32.mrf.mxu1  ;;  %3267 = vmax.xlane.f32.xlu1 %v3266_v29 }
0x1433   : > { %v2792_v32 = vpop.f32.mrf.mxu1 }
0x1434   : > { %4337 = vmatprep.mubr.msk.f32.mxu1 %vm758_vm1, %v2792_v32  ;;  %v4011_v32 = vld [vmem:[%s5619_s10 + $0x28] sm:$0xff] }
0x1435   : > { %4338 = vmatmul.mubr.msk.f32.vlgmr.msra.gmra.mxu1 %vm758_vm1, %v4334_v30  ;;  %v4012_v30 = vld [vmem:[%s5619_s10 + $0x30] sm:$0xff] }
0x147f   : > { %v2996_v34 = vpop.xlane.xlu0 %2995 }
0x1480   : > { %4563 = vrcp.f32 %v2996_v34  ;;  %v4010_v34 = vld [vmem:[%s5619_s10 + $0x20] sm:$0xff] }
0x1483   : > { %v2993_v35 = vpop.xlane.xlu0 %2992 }
0x1484   : > { %4565 = vrcp.f32 %v2993_v35 }
0x1487   : > { %v3004_v37 = vpop.permute.xlu0 %3003 }
0x1488   : > { %4347 = vmatprep.subr.mxu1 %v3004_v37 }
0x1489   : > { %4348 = vmatpush3.msra.mxu1 %v3004_v37 }
0x148a   : > { %4349 = vmatprep.subr.mxu1 %v3002_v39 }
0x148b   : > { %4350 = vmatpush3.msra.mxu1 %v3002_v39 }
0x148c   : > { %4354 = vmatprep.subr.mxu1 %v3970_v16 }
0x148d   : > { %v4564_v40 = vpop.eup %4563 }
0x148e   : > { %v3000_v43 = vmul.f32 %v4564_v40, %v4560_v18 }
0x1491   : > { %v4566_v45 = vpop.eup %4565 }
0x1492   : > { %v2998_v41 = vmul.f32 %v4566_v45, %v4562_v20 }
0x1494   : > { %4351 = vmatprep.mubr.msk.f32.mxu1 %vm846_vm2, %v2998_v41 }
0x1495   : > { %4352 = vmatmul.mubr.msk.f32.vlgmr.msra.gmra.mxu1 %vm846_vm2, %v3000_v43 }
0x1496   : > { %4355 = vmatpush3.msra.mxu1 %v3970_v16  ;;  %v4024_v16 = vld [vmem:[%s5621_s12 + $0x70] sm:$0xff] }
0x14b8   : > { %v3271_v44 = vpop.xlane.xlu0 %3270 }
0x14b9   : > { %v3273_v46 = vsub.f32 %v3265_v25, %v3271_v44  ;;  %v4008_v44 = vld [vmem:[%s5617_s8 + $0x1] ss:$0 sm:$0xff] }
0x14ba   : > { %v3268_v47 = vpop.xlane.xlu1 %3267 }
0x14bb   : > { %v3276_v48 = vmul.f32 1.442695, %v3273_v46  ;;  %v3272_v49 = vsub.f32 %v3264_v27, %v3268_v47 }
0x14bd   : > { %4567 = vpow2.f32 %v3276_v48  ;;  %v3274_v50 = vmul.f32 1.442695, %v3272_v49 }
0x14bf   : > { %4569 = vpow2.f32 %v3274_v50  ;;  %v4009_v50 = vld [vmem:[%s5618_s9 + $0x1] ss:$0 sm:$0xff] }
0x14ca   : > { %v4568_v51 = vpop.eup %4567 }
0x14cb   : > { %v3281_v54 = vsel %vm846_vm2, %v4568_v51, 0.0 }
0x14cc   : > { %v4570_v38 = vpop.eup %4569  ;;  %3282 = vadd.xlane.f32.xlu1 %v3281_v54 }
0x14cd   : > { %v3278_v55 = vsel %vm846_vm2, %v4570_v38, 0.0 }
0x14ce   : > { %3279 = vadd.xlane.f32.xlu0 %v3278_v55  ;;  %v4025_v55 = vld [vmem:[%s5621_s12 + $0x78] sm:$0xff] }
0x14dd   : > { %3288 = vrot.lane.b32.xlu1 %v5353_v56, %s5690_s26 }
0x14e4   : > { %3290 = vrot.lane.b32.xlu0 %v5351_v36, %s5690_s26 }
0x14f5   : > { %v4339_v58 = vpop.f32.mrf.mxu1 }
0x14f6   : > { %v2883_v59 = vadd.f32 %v4339_v58, %v2596_v57  ;;  %v4022_v57 = vld [vmem:[%s5621_s12 + $0x60] sm:$0xff]  ;;  %v4021_v58 = vld [vmem:[%s5621_s12 + $0x58] sm:$0xff] }
0x14f7   : > { %v2873_v60 = vpop.f32.mrf.mxu1 }
0x14f8   : > { %v2882_v8 = vadd.f32 %v2873_v60, %v2595_v6  ;;  %v4019_v60 = vld [vmem:[%s5621_s12 + $0x48] sm:$0xff] }
0x1555   : > { %v4353_v61 = vpop.f32.mrf.mxu1  ;;  %v3283_v62 = vpop.xlane.xlu1 %3282 }
0x1556   : > { %4571 = vrcp.f32 %v3283_v62  ;;  %v4015_v62 = vld [vmem:[%s5620_s11 + $0x1] ss:$0 sm:$0xff] }
0x1557   : > { %v3079_v63 = vpop.f32.mrf.mxu1  ;;  %v3280_v0 = vpop.xlane.xlu0 %3279 }
0x1558   : > { %4573 = vrcp.f32 %v3280_v0  ;;  %4356 = vmatprep.mubr.msk.f32.mxu1 %vm758_vm1, %v3079_v63 }
0x1559   : > { %4357 = vmatmul.mubr.msk.f32.vlgmr.msra.gmra.mxu1 %vm758_vm1, %v4353_v61  ;;  %v3289_v36 = vpop.permute.xlu1 %3288  ;;  %v4018_v61 = vld [vmem:[%s5621_s12 + $0x40] sm:$0xff] }
0x155b   : > { %v3291_v56 = vpop.permute.xlu0 %3290 }
0x155c   : > { %4366 = vmatprep.subr.mxu1 %v3291_v56 }
0x155d   : > { %4367 = vmatpush3.msra.mxu1 %v3291_v56 }
0x155e   : > { %4368 = vmatprep.subr.mxu1 %v3289_v36 }
0x155f   : > { %4369 = vmatpush3.msra.mxu1 %v3289_v36 }
0x1560   : > { %4373 = vmatprep.subr.mxu1 %v3971_v5 }
0x1563   : > { %v4572_v1 = vpop.eup %4571 }
0x1564   : > { %v3287_v4 = vmul.f32 %v4572_v1, %v4568_v51 }
0x1565   : > { %v4574_v2 = vpop.eup %4573 }
0x1566   : > { %v3285_v3 = vmul.f32 %v4574_v2, %v4570_v38 }
0x1568   : > { %4370 = vmatprep.mubr.msk.f32.mxu1 %vm846_vm2, %v3285_v3 }
0x1569   : > { %4371 = vmatmul.mubr.msk.f32.vlgmr.msra.gmra.mxu1 %vm846_vm2, %v3287_v4 }
0x156a   : > { %4374 = vmatpush3.msra.mxu1 %v3971_v5 }
0x156b   : > { %4389 = vmatprep.subr.mxu1 %v4025_v55 }
0x1619   : > { %v4358_v7 = vpop.f32.mrf.mxu1 }
0x161a   : > { %v3170_v9 = vadd.f32 %v4358_v7, %v2883_v59  ;;  %v4020_v59 = vld [vmem:[%s5621_s12 + $0x50] sm:$0xff] }
0x161b   : > { %v3160_v10 = vpop.f32.mrf.mxu1 }
0x161c   : > { %v3169_v11 = vadd.f32 %v3160_v10, %v2882_v8 }
0x1629   : > { %v4372_v12 = vpop.f32.mrf.mxu1 }
0x162b   : > { %v3366_v42 = vpop.f32.mrf.mxu1 }
0x162c   : > { %4375 = vmatprep.mubr.msk.f32.mxu1 %vm758_vm1, %v3366_v42 }
0x162d   : > { %4376 = vmatmul.mubr.msk.f32.vlgmr.msra.gmra.mxu1 %vm758_vm1, %v4372_v12 }
0x162e   : > { %4390 = vmatpush3.msra.mxu1 %v4025_v55 }
0x162f   : > { %4391 = vmatprep.subr.mxu1 %v4024_v16 }
0x1630   : > { %4392 = vmatpush3.msra.mxu1 %v4024_v16 }
0x1631   : > { %4393 = vmatprep.subr.mxu1 %v4023_v17 }
0x1632   : > { %4394 = vmatpush3.msra.mxu1 %v4023_v17 }
0x1633   : > { %4395 = vmatprep.subr.mxu1 %v4022_v57 }
0x1634   : > { %4396 = vmatpush3.msra.mxu1 %v4022_v57 }
0x1635   : > { %4397 = vmatprep.subr.mxu1 %v4021_v58 }
0x1636   : > { %4398 = vmatpush3.msra.mxu1 %v4021_v58 }
0x1637   : > { %4399 = vmatprep.subr.mxu1 %v4020_v59 }
0x1638   : > { %4400 = vmatpush3.msra.mxu1 %v4020_v59 }
0x1639   : > { %4401 = vmatprep.subr.mxu1 %v4019_v60 }
0x163a   : > { %4402 = vmatpush3.msra.mxu1 %v4019_v60 }
0x163b   : > { %4403 = vmatprep.subr.mxu1 %v4018_v61 }
0x163c   : > { %4404 = vmatpush3.msra.mxu1 %v4018_v61 }
0x16ed   : > { %v4377_v13 = vpop.f32.mrf.mxu1 }
0x16ee   : > { %v3457_v14 = vadd.f32 %v4377_v13, %v3170_v9 }
0x16ef   : > { %v3447_v15 = vpop.f32.mrf.mxu1 }
0x16f0   : > { %v3456_v18 = vadd.f32 %v3447_v15, %v3169_v11  ;;  %v3459_v19 = vadd.f32 %v3457_v14, %v5342_v53 }
0x16f2   : > { %v3467_v20 = vsel %vm611_vm0, %v3459_v19, 0.0  ;;  %v3458_v33 = vadd.f32 %v3456_v18, %v5340_v52  ;;  %v4013_v52 = vld [vmem:[%s5619_s10 + $0x38] sm:$0xff] }
0x16f3   : > { %3468 = vadd.xlane.f32.xlu0 %v3467_v20  ;;  %4378 = vmatprep.subr.mxu0 %v4013_v52  ;;  %v4027_v20 = vld [vmem:[%s5683_s19 + $0x1] ss:$0 sm:$0xff] }
0x16f4   : > { %v3464_v31 = vsel %vm611_vm0, %v3458_v33, 0.0  ;;  %4379 = vmatpush3.msra.mxu0 %v4013_v52 }
0x16f5   : > { %3465 = vadd.xlane.f32.xlu1 %v3464_v31  ;;  %4380 = vmatprep.subr.mxu0 %v4012_v30 }
0x16f6   : > { %4381 = vmatpush3.msra.mxu0 %v4012_v30 }
0x16f7   : > { %4382 = vmatprep.subr.mxu0 %v4011_v32 }
0x16f8   : > { %4383 = vmatpush3.msra.mxu0 %v4011_v32 }
0x16f9   : > { %4384 = vmatprep.subr.mxu0 %v4010_v34 }
0x16fa   : > { %4385 = vmatpush3.msra.mxu0 %v4010_v34 }
0x177c   : > { %v3469_v21 = vpop.xlane.xlu0 %3468 }
0x177d   : > { %v3471_v22 = vmul.f32 0.03125, %v3469_v21 }
0x177e   : > { %v3466_v23 = vpop.xlane.xlu1 %3465 }
0x177f   : > { %v3473_v24 = vsub.f32 %v3459_v19, %v3471_v22  ;;  %v3470_v25 = vmul.f32 0.03125, %v3466_v23 }
0x1781   : > { %v3472_v26 = vsub.f32 %v3458_v33, %v3470_v25  ;;  %v3475_v27 = vmul.f32 %v3473_v24, %v3473_v24 }
0x1783   : > { %v3479_v28 = vsel %vm611_vm0, %v3475_v27, 0.0  ;;  %v3474_v29 = vmul.f32 %v3472_v26, %v3472_v26 }
0x1784   : > { %3480 = vadd.xlane.f32.xlu1 %v3479_v28 }
0x1785   : > { %v3476_v53 = vsel %vm611_vm0, %v3474_v29, 0.0 }
0x1786   : > { %3477 = vadd.xlane.f32.xlu0 %v3476_v53 }
0x180d   : > { %v3481_v35 = vpop.xlane.xlu1 %3480 }
0x180e   : > { %v3483_v37 = vmul.f32 0.03125, %v3481_v35 }
0x180f   : > { %v3478_v39 = vpop.xlane.xlu0 %3477 }
0x1810   : > { %v3485_v40 = vadd.f32 1e-05, %v3483_v37  ;;  %v3482_v45 = vmul.f32 0.03125, %v3478_v39 }
0x1812   : > { %4575 = vrsqrt.f32 %v3485_v40  ;;  %v3484_v41 = vadd.f32 1e-05, %v3482_v45 }
0x1814   : > { %4577 = vrsqrt.f32 %v3484_v41 }
0x181f   : > { %v4576_v43 = vpop.eup %4575 }
0x1820   : > { %v3489_v46 = vmul.f32 %v4576_v43, %v3473_v24 }
0x1821   : > { %v4578_v47 = vpop.eup %4577 }
0x1822   : > { %v3488_v48 = vmul.f32 %v4578_v47, %v3472_v26  ;;  %v3497_v49 = vmul.f32 %v4008_v44, %v3489_v46  ;;  %v4032_v47 = vld [vmem:[%s5684_s28 + $0x1] ss:$0 sm:$0xff] }
0x1824   : > { %v3496_v51 = vmul.f32 %v4008_v44, %v3488_v48  ;;  %v3505_v38 = vadd.f32 %v4009_v50, %v3497_v49 }
0x1826   : > { %v3504_v54 = vadd.f32 %v4009_v50, %v3496_v51  ;;  %v4033_v50 = vld [vmem:[%s5685_s18 + $0x1] ss:$0 sm:$0xff] }
0x1828   : > { %4386 = vmatprep.mubr.msk.f32.mxu0 %vm611_vm0, %v3504_v54 }
0x1829   : > { %4387 = vmatmul.mubr.msk.f32.vlgmr.msra.gmra.mxu0 %vm611_vm0, %v3505_v38 }
0x18e9   : > { %v4388_v63 = vpop.f32.mrf.mxu0 }
0x18ea   : > { %v3597_v0 = vadd.f32 %v4388_v63, %v4015_v62 }
0x18eb   : > { %v3591_v56 = vpop.f32.mrf.mxu0 }
0x18ec   : > { %v3603_v36 = vmul.f32 0.044715, %v3597_v0  ;;  %v3592_v1 = vadd.f32 %v4015_v62, %v3591_v56  ;;  %v3601_v15 = vmul.f32 0.5, %v3597_v0 }
0x18ee   : > { %v3605_v2 = vmul.f32 %v3603_v36, %v3597_v0  ;;  %v3602_v3 = vmul.f32 0.044715, %v3592_v1  ;;  %v3600_v13 = vmul.f32 0.5, %v3592_v1 }
0x18f0   : > { %v3607_v4 = vmul.f32 %v3605_v2, %v3597_v0  ;;  %v3604_v5 = vmul.f32 %v3602_v3, %v3592_v1 }
0x18f2   : > { %v3609_v6 = vadd.f32 %v3607_v4, %v3597_v0  ;;  %v3606_v7 = vmul.f32 %v3604_v5, %v3592_v1 }
0x18f4   : > { %v3611_v8 = vmul.f32 0.7978846, %v3609_v6  ;;  %v3608_v9 = vadd.f32 %v3606_v7, %v3592_v1 }
0x18f6   : > { %4579 = vtanh.f32 %v3611_v8  ;;  %v3610_v10 = vmul.f32 0.7978846, %v3608_v9 }
0x18f8   : > { %4581 = vtanh.f32 %v3610_v10 }
0x1903   : > { %v4580_v11 = vpop.eup %4579 }
0x1904   : > { %v3615_v42 = vadd.f32 1.0, %v4580_v11 }
0x1905   : > { %v4582_v12 = vpop.eup %4581 }
0x1906   : > { %v3614_v14 = vadd.f32 1.0, %v4582_v12  ;;  %v3617_v19 = vmul.f32 %v3615_v42, %v3601_v15 }
0x1908   : > { %v3616_v18 = vmul.f32 %v3614_v14, %v3600_v13 }
0x190a   : > { %4405 = vmatprep.mubr.msk.f32.mxu1 %vm2077_vm3, %v3616_v18 }
0x190b   : > { %4406 = vmatmul.mubr.msk.f32.vlgmr.msra.gmra.mxu1 %vm2077_vm3, %v3617_v19 }
0x19cb   : > { %v4407_v33 = vpop.f32.mrf.mxu1 }
0x19cc   : > { %v3713_v31 = vadd.f32 %v4407_v33, %v4027_v20 }
0x19cd   : > { %v3707_v21 = vpop.f32.mrf.mxu1 }
0x19ce   : > { %v3708_v22 = vadd.f32 %v4027_v20, %v3707_v21  ;;  %v3717_v23 = vadd.f32 %v3713_v31, %v3505_v38 }
0x19d0   : > { %v3725_v24 = vsel %vm611_vm0, %v3717_v23, 0.0  ;;  %v3716_v25 = vadd.f32 %v3708_v22, %v3504_v54 }
0x19d1   : > { %3726 = vadd.xlane.f32.xlu1 %v3725_v24 }
0x19d2   : > { %v3722_v26 = vsel %vm611_vm0, %v3716_v25, 0.0 }
0x19d3   : > { %3723 = vadd.xlane.f32.xlu0 %v3722_v26 }
0x1a5a   : > { %v3727_v27 = vpop.xlane.xlu1 %3726 }
0x1a5b   : > { %v3729_v28 = vmul.f32 0.03125, %v3727_v27 }
0x1a5c   : > { %v3724_v29 = vpop.xlane.xlu0 %3723 }
0x1a5d   : > { %v3731_v53 = vsub.f32 %v3717_v23, %v3729_v28  ;;  %v3728_v52 = vmul.f32 0.03125, %v3724_v29 }
0x1a5f   : > { %v3730_v30 = vsub.f32 %v3716_v25, %v3728_v52  ;;  %v3733_v32 = vmul.f32 %v3731_v53, %v3731_v53 }
0x1a61   : > { %v3737_v34 = vsel %vm611_vm0, %v3733_v32, 0.0  ;;  %v3732_v35 = vmul.f32 %v3730_v30, %v3730_v30 }
0x1a62   : > { %3738 = vadd.xlane.f32.xlu1 %v3737_v34 }
0x1a63   : > { %v3734_v37 = vsel %vm611_vm0, %v3732_v35, 0.0 }
0x1a64   : > { %3735 = vadd.xlane.f32.xlu0 %v3734_v37 }
0x1aeb   : > { %v3739_v39 = vpop.xlane.xlu1 %3738 }
0x1aec   : > { %v3741_v40 = vmul.f32 0.03125, %v3739_v39 }
0x1aed   : > { %v3736_v45 = vpop.xlane.xlu0 %3735 }
0x1aee   : > { %v3743_v41 = vadd.f32 1e-05, %v3741_v40  ;;  %v3740_v43 = vmul.f32 0.03125, %v3736_v45 }
0x1af0   : > { %4583 = vrsqrt.f32 %v3743_v41  ;;  %v3742_v44 = vadd.f32 1e-05, %v3740_v43 }
0x1af2   : > { %4585 = vrsqrt.f32 %v3742_v44 }
0x1afd   : > { %v4584_v46 = vpop.eup %4583 }
0x1afe   : > { %v3747_v48 = vmul.f32 %v4584_v46, %v3731_v53 }
0x1aff   : > { %v4586_v49 = vpop.eup %4585 }
0x1b00   : > { %v3755_v51 = vmul.f32 %v4032_v47, %v3747_v48  ;;  %v3746_v54 = vmul.f32 %v4586_v49, %v3730_v30 }
0x1b02   : > { %v3763_v38 = vadd.f32 %v4033_v50, %v3755_v51  ;;  %v3754_v55 = vmul.f32 %v4032_v47, %v3746_v54 }
0x1b04   : > { %v3762_v16 = vadd.f32 %v4033_v50, %v3754_v55  ;;  %3765 = vst.msk [vmem:[%s604_s30 + $0x8] sm:$0xff] %vm611_vm0, %v3763_v38 }
0x1b06   : > { %3764 = vst.msk [vmem:[%s604_s30] sm:$0xff] %vm611_vm0, %v3762_v16 }
0x1b07   : > { %4710 = shalt.err (!%p4707_p0)
}
0x1b08   : > { %s4711_s26 = scalar_lea.hbm %s5562_s17, 256  ;;  %s4715_s30 = scalar_lea.hbm %s5692_s3, 512 }
0x1b09   : > { %p4712_p9 = scmp.ne.s32.totalorder %s5562_s17, %s4711_s26  ;;  %p4716_p3 = scmp.lt.s32.totalorder %s5562_s17, %s5692_s3 }
0x1b0a   : > { %p4717_p5 = scmp.lt.s32.totalorder %s4715_s30, %s4711_s26 }
0x1b0b   : > { %p4713_p8 = pnand %p4712_p9, %p5693_p12 }
0x1b0c   : > { %p4718_p10 = por %p4717_p5, %p4716_p3 }
0x1b0d   : > { %p4714_p13 = pneg %p4713_p8 }
0x1b0f   : > { %p4719_p1 = pnand %p4718_p10, %p4714_p13 }
0x1b11   : > { %4722 = shalt.err (!%p4719_p1)
}
0x1b12   : > { %s4793_s2 = smov 128   ;;  %s4794_s29 = smov 8  }
0x1b13   : > { %4420 = dma.vmem_to_hbm [thread:$0]  (%p5693_p12), %s5564_s14, 256, %s5562_s17, %s3767_s25, %s4793_s2, %s4793_s2, %s4794_s29  }
0x1b14 PF: > { %s5694_s16 = sld [smem:[#allocation16_spill]]  ;;  %p5697_p7 = scmp.ge.s32.totalorder %s4773_s24, 2 }
0x1b15   : > { %s5695_s15 = sld [smem:[#allocation21_spill]] }
0x1b1a   : > { %s3795_s27 = sand.u32 1, %s5694_s16  }
0x1b1b   : > { %p5696_p11 = scmp.ne.s32.totalorder %s5695_s15, 0  ;;  %s3796_s26 = scalar_lea.sflag [#allocation4], %s3795_s27 }
0x1b1d   : > { %p4437_p2 = pnand %p5697_p7, %p5696_p11 }
0x1b1f   : > { %p4438_p4 = pneg %p4437_p2 }
0x1b21   : > { %4756 = dma.done.wait (%p4438_p4), %s3796_s26, 256  }
0x1b22   : > { %4758 = vsyncadd (%p4438_p4), %s3796_s26, 4294967040  ;;  %s5698_s24 = sld [smem:[#allocation18_spill]]  ;;  %s5701_s21 = smov %s4765_s22 }
0x1b23   : > { %s5699_s0 = sld [smem:[#allocation17_spill]] }
0x1b24   : > { %s5700_s23 = sld [smem:[#allocation19_spill]] }
0x1b28   : > { %p33_p6 = scmp.ge.s32.totalorder %s5698_s24, 4  }
0x1b29   : > { %s5702_s22 = smov %s5699_s0 }
0x1b2a   :  { %35 = sbr.rel (!%p33_p6) target bundleno = 16 (0x10), region = 162 }
0x1b2f   :  { %3801 = vsyncpa [#allocation3], 1 }
0x1b30   :  { %3803 = vsyncpa [#allocation3 + $0x1], 1 }
0x1b31   :  { %3804 = vsyncpa [#allocation6], 1 }
0x1b32   :  { %3806 = vsyncpa [#allocation6 + $0x1], 1 }
0x1b33   :  { %3807 = vsyncpa [#allocation9], 1 }
0x1b34   :  { %3808 = vsyncpa [#allocation4], 1 }
0x1b35   :  { %3810 = vsyncpa [#allocation4 + $0x1], 1 }

</bundles_post_ra>
